<compile_context>
chip_gen: v5e
topology: v5e:2x2
jax: 0.10.0
libtpu: 0.0.40
codegen_flags: <defaults>
</compile_context>

<pallas_src>
import functools

import jax
import jax.numpy as jnp
from jax import lax
from jax.experimental import pallas as pl
from jax.experimental.pallas import tpu as pltpu
from jax.scipy.special import gammaln

_EPS = 1e-8
_HALF_LOG_2PI = 0.9189385332046727  # 0.5 * log(2*pi)


def _sum11(x):
    # Full reduction of a 2-D tile to a (1, 1) tile: lane reduce then sublane reduce.
    return jnp.sum(jnp.sum(x, axis=1, keepdims=True), axis=0, keepdims=True)


def _lgamma_shift4(z):
    """lgamma(z) for z > 0 via lgamma(z) = lgamma(z+4) - log(z(z+1)(z+2)(z+3)).

    Stirling series (3 correction terms) is evaluated at z+4 >= 4, abs error
    <~ 4e-8; the shift recurrence guards small z (e.g. obs = 0 or small theta).
    Cost per element: 2 logs + 1 approx reciprocal (EUP) + a few VALU ops.
    """
    zs = z + 4.0
    r = pl.reciprocal(zs, approx=True)       # feeds only the <=1/(12z) correction
    r2 = r * r
    series = r * (1.0 / 12.0 - r2 * (1.0 / 360.0 - r2 * (1.0 / 1260.0)))
    stirling = (zs - 0.5) * jnp.log(zs) - zs + _HALF_LOG_2PI + series
    return stirling - jnp.log(z * (z + 1.0) * (z + 2.0) * (z + 3.0))


# ----------------------------------------------------------------------------
# Kernel factory (static config: batch, n_genes, sim / interaction presence).
# ----------------------------------------------------------------------------
def _make_kernel(batch, n_genes, uniform_sim, has_inter, n_inter_packed):
    inv_b = 1.0 / float(batch)

    def kernel(*args):
        scal_ref, pu_ref, ps_ref, ou_ref, os_ref, v_ref, prm_ref = args[:7]
        pos = 7
        inter_ref = None
        if has_inter:
            inter_ref = args[pos]
            pos += 1
        sim_ref = None
        if not uniform_sim:
            sim_ref = args[pos]
            pos += 1
        out_ref, m_out_ref = args[pos], args[pos + 1]
        pos += 2
        (msq_ref, au_ref, as_ref, l1_ref, l2_ref, li_ref, dir_ref) = args[pos:pos + 7]

        p = pl.program_id(0)      # 0: NLL / msq / params,  1: direction term
        t = pl.program_id(1)      # gene tile
        n_t = pl.num_programs(1)

        theta = scal_ref[0]
        log_theta = scal_ref[1]
        lg_theta = scal_ref[2]    # lgamma(theta) (scalar, precomputed)

        # ---- init accumulators on the very first grid step ----
        @pl.when((p == 0) & (t == 0))
        def _init():
            msq_ref[...] = jnp.zeros_like(msq_ref)
            au_ref[...] = jnp.zeros_like(au_ref)
            as_ref[...] = jnp.zeros_like(as_ref)
            l1_ref[...] = jnp.zeros_like(l1_ref)
            l2_ref[...] = jnp.zeros_like(l2_ref)
            li_ref[...] = jnp.zeros_like(li_ref)
            dir_ref[...] = jnp.zeros_like(dir_ref)

        # ---- pass 0: NB NLL partials, per-row ||v||^2, parameter reductions ----
        @pl.when(p == 0)
        def _pass0():
            def lp_sum(pred_ref, obs_ref):
                pred = pred_ref[...].astype(jnp.float32)
                obs = obs_ref[...].astype(jnp.float32)
                mu = jnp.maximum(pred, _EPS)
                log_mu = jnp.log(mu)
                log_tpm = jnp.log(theta + mu)
                # torch NegativeBinomial(total_count=theta, probs=theta/(theta+mu))
                # log_prob, minus the constant -lgamma(theta) term (added at finalize).
                lp = (theta * (log_mu - log_tpm)
                      + obs * (log_theta - log_tpm)
                      + _lgamma_shift4(theta + obs)
                      - _lgamma_shift4(1.0 + obs))
                return _sum11(lp)

            au_ref[...] += lp_sum(pu_ref, ou_ref)
            as_ref[...] += lp_sum(ps_ref, os_ref)

            v = v_ref[...].astype(jnp.float32)
            msq_ref[...] += jnp.sum(v * v, axis=1, keepdims=True)

            if has_inter:
                w = inter_ref[...].astype(jnp.float32)
                abs_sum = _sum11(jnp.abs(w))
                l1_ref[...] += abs_sum
                li_ref[...] += abs_sum
                l2_ref[...] += _sum11(w * w)

            @pl.when(t == 0)
            def _small_params_once():
                prm = prm_ref[...].astype(jnp.float32)
                ap = jnp.abs(prm)
                l1_ref[...] += _sum11(ap)
                l2_ref[...] += _sum11(prm * prm)
                if n_inter_packed > 0:
                    r_, c_ = prm.shape
                    flat_idx = (lax.broadcasted_iota(jnp.int32, (r_, c_), 0) * c_
                                + lax.broadcasted_iota(jnp.int32, (r_, c_), 1))
                    li_ref[...] += _sum11(jnp.where(flat_idx < n_inter_packed, ap, 0.0))

        # ---- pass 1: velocity direction term (needs full row norms from pass 0) ----
        @pl.when(p == 1)
        def _pass1():
            v = v_ref[...].astype(jnp.float32)
            m = jnp.sqrt(msq_ref[...])                        # (B, 1)
            inv_m = pl.reciprocal(jnp.maximum(m, 1e-12))      # per-row, not per-element
            vn = v * inv_m                                    # F.normalize(p=2, dim=1)
            if uniform_sim:
                s = jnp.sum(vn, axis=0, keepdims=True)        # (1, TG)
                dir_ref[...] += jnp.sum(s * s, axis=1, keepdims=True)
            else:
                sv = jnp.dot(sim_ref[...].astype(jnp.bfloat16),
                             vn.astype(jnp.bfloat16),
                             preferred_element_type=jnp.float32)   # (B, TG), MXU bf16
                dir_ref[...] += _sum11(vn * sv)

        # ---- finalize on the last grid step: apply per-call constants once ----
        @pl.when((p == 1) & (t == n_t - 1))
        def _finalize():
            nll_u = (-inv_b) * au_ref[...] + float(n_genes) * lg_theta
            nll_s = (-inv_b) * as_ref[...] + float(n_genes) * lg_theta

            msq = msq_ref[...]
            m = jnp.sqrt(msq)
            m_out_ref[...] = m                                # row norms -> wrapper

            if uniform_sim:
                # sum_ij (1/B)(m_i - m_j)^2 == 2 * sum_i (m_i - mean(m))^2 (centered,
                # avoids cancellation of two ~equal large sums).
                mbar = inv_b * jnp.sum(m, axis=0, keepdims=True)
                d = m - mbar
                mag = 2.0 * jnp.sum(d * d, axis=0, keepdims=True)
                dirn = float(batch) - inv_b * dir_ref[...]
            else:
                # Tiny (B,B)-only algebra finishes in the wrapper from m_out & sim.
                mag = jnp.zeros((1, 1), jnp.float32)
                dirn = dir_ref[...]                           # raw sum_ij sim_ij cos_ij

            vals = (nll_u, nll_s, mag, dirn, l1_ref[...], l2_ref[...], li_ref[...])
            lane = lax.broadcasted_iota(jnp.int32, (1, 128), 1)
            out = jnp.zeros((1, 128), jnp.float32)
            for k, val in enumerate(vals):
                out = jnp.where(lane == k, val, out)
            out_ref[...] = out                                # single lane-dense store

    return kernel


# ----------------------------------------------------------------------------
# Host-side helpers
# ----------------------------------------------------------------------------
def _choose_gene_tile(n_genes, gene_tile):
    if gene_tile is not None and gene_tile % 128 == 0 and n_genes % gene_tile == 0:
        return int(gene_tile)
    if n_genes % 128 != 0:
        return int(n_genes)            # single full-width tile (block == full dims)
    for tg in (1024, 512, 256, 128):   # biggest tile that divides G
        if n_genes % tg == 0:
            return tg
    return int(n_genes)


def _split_params(model_params, n_genes):
    """Interaction matrix -> own gridded operand; everything else -> (R,128) buffer."""
    inter_arrays, other_flat = [], []
    for name, p in model_params.items():
        arr = jnp.asarray(p, jnp.float32)
        if 'interaction_matrix' in name:
            inter_arrays.append(arr)
        else:
            other_flat.append(jnp.ravel(arr))

    inter2d = None
    packed_inter = []
    if (len(inter_arrays) == 1 and inter_arrays[0].ndim >= 2
            and inter_arrays[0].shape[-1] == n_genes):
        inter2d = inter_arrays[0].reshape(-1, n_genes)
    else:
        packed_inter = [jnp.ravel(a) for a in inter_arrays]

    n_inter_packed = int(sum(int(a.size) for a in packed_inter))
    pieces = packed_inter + other_flat
    flat = jnp.concatenate(pieces) if pieces else jnp.zeros((0,), jnp.float32)
    n_total = int(flat.size)
    rows = max(8, 8 * ((n_total + 1023) // 1024))
    flat = jnp.pad(flat, (0, rows * 128 - n_total))
    return inter2d, flat.reshape(rows, 128), n_inter_packed


# ----------------------------------------------------------------------------
# Stage1TotalLoss forward (functional); defaults mirror the PyTorch config
# fallbacks in Stage1TotalLoss.__init__.
# ----------------------------------------------------------------------------
def stage1_total_loss(outputs, targets, model_params, log_theta,
                      atac_mask=None, similarity_matrix=None,
                      reconstruction_weight=1.0, regulatory_weight=0.1,
                      velocity_coherence_weight=0.1, regularization_weight=0.01,
                      l1_weight=0.01, l2_weight=0.001,
                      interaction_sparsity_weight=0.01,
                      magnitude_weight=1.0, direction_weight=1.0,
                      gene_tile=None):
    pred_u = outputs['pred_unspliced']
    pred_s = outputs['pred_spliced']
    vel = outputs['velocity']
    obs_u = targets['unspliced']
    obs_s = targets['spliced']
    batch, n_genes = pred_u.shape

    tg = _choose_gene_tile(n_genes, gene_tile)
    n_t = n_genes // tg

    # Scalar-only host path (no full-array gammaln passes any more).
    log_theta = jnp.asarray(log_theta, jnp.float32)
    theta = jnp.exp(log_theta)
    lg_theta = gammaln(theta)
    scalars = jnp.stack([theta, log_theta, lg_theta]).astype(jnp.float32)

    inter2d, params2d, n_inter_packed = _split_params(model_params, n_genes)
    has_inter = inter2d is not None
    uniform_sim = similarity_matrix is None

    kernel = _make_kernel(batch, n_genes, uniform_sim, has_inter, n_inter_packed)

    # pass-0-only operands stay pinned to their last block during pass 1
    # (no redundant DMAs across the pass transition).
    pass0_map = lambda p, t: (0, t * (1 - p) + (n_t - 1) * p)
    both_map = lambda p, t: (0, t)
    const_map = lambda p, t: (0, 0)

    operands = [scalars, pred_u, pred_s, obs_u, obs_s, vel, params2d]
    in_specs = [
        pl.BlockSpec(memory_space=pltpu.MemorySpace.SMEM),
        pl.BlockSpec((batch, tg), pass0_map),
        pl.BlockSpec((batch, tg), pass0_map),
        pl.BlockSpec((batch, tg), pass0_map),
        pl.BlockSpec((batch, tg), pass0_map),
        pl.BlockSpec((batch, tg), both_map),
        pl.BlockSpec(params2d.shape, const_map),          # small params, resident
    ]
    if has_inter:
        operands.append(inter2d)
        in_specs.append(pl.BlockSpec((inter2d.shape[0], tg), pass0_map))
    if not uniform_sim:
        sim = jnp.asarray(similarity_matrix)
        operands.append(sim)
        in_specs.append(pl.BlockSpec(sim.shape, const_map))  # resident (B,B)

    out_shape = (jax.ShapeDtypeStruct((1, 128), jnp.float32),   # packed loss scalars
                 jax.ShapeDtypeStruct((batch, 1), jnp.float32)) # row velocity norms
    out_specs = (pl.BlockSpec((1, 128), const_map),
                 pl.BlockSpec((batch, 1), const_map))

    scratch_shapes = [
        pltpu.VMEM((batch, 1), jnp.float32),   # per-row ||v||^2 accumulator
        pltpu.VMEM((1, 1), jnp.float32),       # nll_u partial
        pltpu.VMEM((1, 1), jnp.float32),       # nll_s partial
        pltpu.VMEM((1, 1), jnp.float32),       # l1
        pltpu.VMEM((1, 1), jnp.float32),       # l2
        pltpu.VMEM((1, 1), jnp.float32),       # l1 interaction
        pltpu.VMEM((1, 1), jnp.float32),       # direction partial
    ]

    # Generation-aware VMEM budgeting: raise the scoped limit only when the
    # double-buffered tiles actually need it (cap well under v7x's 64 MiB).
    inter_rows = inter2d.shape[0] if has_inter else 0
    tile_bytes = (5 * batch + inter_rows) * tg * 4
    resident_bytes = int(params2d.size) * 4 + (0 if uniform_sim else int(sim.size) * 4)
    need = 2 * tile_bytes + resident_bytes + (1 << 20)
    vmem_limit = None if need <= (12 << 20) else int(min(need + (8 << 20), 64 << 20))

    raw, m_rows = pl.pallas_call(
        kernel,
        out_shape=out_shape,
        grid=(2, n_t),
        in_specs=in_specs,
        out_specs=out_specs,
        scratch_shapes=scratch_shapes,
        compiler_params=pltpu.CompilerParams(
            dimension_semantics=("arbitrary", "arbitrary"),
            vmem_limit_bytes=vmem_limit),
    )(*operands)

    nll_u, nll_s = raw[0, 0], raw[0, 1]
    l1_sum, l2_sum, inter_sum = raw[0, 4], raw[0, 5], raw[0, 6]
    if uniform_sim:
        mag_l, dir_l = raw[0, 2], raw[0, 3]
    else:
        # (B,B)-only algebra: trivial, done here from the kernel's row norms.
        sim32 = jnp.asarray(similarity_matrix).astype(jnp.float32)
        m = m_rows[:, 0]
        diff = m[:, None] - m[None, :]
        mag_l = jnp.sum(sim32 * diff * diff)
        dir_l = jnp.sum(sim32) - raw[0, 3]

    losses = {}

    # --- reconstruction (NB NLL) ---
    recon_total = nll_u + nll_s
    losses['reconstruction_total'] = recon_total
    losses['reconstruction_unspliced'] = nll_u
    losses['reconstruction_spliced'] = nll_s
    losses['theta'] = theta

    # --- regulatory network losses ---
    # TODO(synk): RegulatoryNetworkLoss needs the external RegulatoryNetwork
    # module (get_regularization_loss / get_jacobian_regularization_loss /
    # get_interaction_matrix) which is not defined here; we follow the
    # `model.regulatory_network is None` branch and emit zeros.
    zero = jnp.float32(0.0)
    losses['regulatory_total'] = zero
    losses['regulatory_sparsity'] = zero
    losses['regulatory_jacobian'] = zero
    losses['regulatory_atac_violation'] = zero

    # --- velocity coherence ---
    vel_total = magnitude_weight * mag_l + direction_weight * dir_l
    losses['velocity_coherence_total'] = vel_total
    losses['velocity_coherence_magnitude'] = mag_l
    losses['velocity_coherence_direction'] = dir_l

    # --- parameter regularization ---
    reg_l1 = l1_weight * l1_sum
    reg_l2 = l2_weight * l2_sum
    reg_int = interaction_sparsity_weight * inter_sum
    reg_total = reg_l1 + reg_l2 + reg_int
    losses['regularization_total'] = reg_total
    losses['regularization_l1'] = reg_l1
    losses['regularization_l2'] = reg_l2
    losses['regularization_interaction_sparsity'] = reg_int

    losses['total'] = (reconstruction_weight * recon_total
                       + regulatory_weight * losses['regulatory_total']
                       + velocity_coherence_weight * vel_total
                       + regularization_weight * reg_total)
    return losses


# ----------------------------------------------------------------------------
# Pure-JAX reference (for correctness check only)
# ----------------------------------------------------------------------------
def _reference(outputs, targets, model_params, log_theta, similarity_matrix=None):
    theta = jnp.exp(jnp.asarray(log_theta, jnp.float32))

    def nll(pred, obs):
        mu = jnp.maximum(pred, _EPS)
        lp = (theta * (jnp.log(mu) - jnp.log(theta + mu))
              + obs * (jnp.log(theta) - jnp.log(theta + mu))
              + gammaln(theta + obs) - gammaln(1.0 + obs) - gammaln(theta))
        return jnp.mean(-jnp.sum(lp, axis=-1))

    nll_u = nll(outputs['pred_unspliced'], targets['unspliced'])
    nll_s = nll(outputs['pred_spliced'], targets['spliced'])
    recon = nll_u + nll_s

    v = outputs['velocity']
    bsz = v.shape[0]
    sim = (jnp.full((bsz, bsz), 1.0 / bsz, jnp.float32) if similarity_matrix is None
           else jnp.asarray(similarity_matrix, jnp.float32))
    mag = jnp.linalg.norm(v, axis=1, keepdims=True)
    mag_loss = jnp.sum(sim * (mag - mag.T) ** 2)
    vn = v / jnp.maximum(mag, 1e-12)
    dir_loss = jnp.sum(sim * (1.0 - vn @ vn.T))
    vel = mag_loss + dir_loss

    l1 = sum(jnp.sum(jnp.abs(jnp.asarray(p, jnp.float32))) for p in model_params.values())
    l2 = sum(jnp.sum(jnp.asarray(p, jnp.float32) ** 2) for p in model_params.values())
    inter = sum(jnp.sum(jnp.abs(jnp.asarray(p, jnp.float32)))
                for n, p in model_params.items() if 'interaction_matrix' in n)
    reg = 0.01 * l1 + 0.001 * l2 + 0.01 * inter
    total = 1.0 * recon + 0.1 * 0.0 + 0.1 * vel + 0.01 * reg
    return {'reconstruction_total': recon,
            'velocity_coherence_total': vel,
            'velocity_coherence_magnitude': mag_loss,
            'velocity_coherence_direction': dir_loss,
            'regularization_total': reg,
            'total': total}


if __name__ == "__main__":
    B, G, H = 8, 512, 32
    key = jax.random.PRNGKey(0)
    ks = jax.random.split(key, 10)

    outputs = {
        'pred_unspliced': jax.random.uniform(ks[0], (B, G), minval=0.0, maxval=5.0),
        'pred_spliced': jax.random.uniform(ks[1], (B, G), minval=0.0, maxval=5.0),
        'velocity': jax.random.normal(ks[2], (B, G)),
    }
    targets = {
        'unspliced': jnp.floor(jax.random.uniform(ks[3], (B, G), maxval=8.0)),
        'spliced': jnp.floor(jax.random.uniform(ks[4], (B, G), maxval=8.0)),
    }
    # synthetic "model" parameters (shapes implied by the module)
    model_params = {
        'regulatory_network.interaction_matrix': 0.1 * jax.random.normal(ks[5], (G, G)),
        'encoder.weight': 0.1 * jax.random.normal(ks[6], (H, G)),
        'encoder.bias': 0.1 * jax.random.normal(ks[7], (H,)),
        'decoder.weight': 0.1 * jax.random.normal(ks[8], (G, H)),
    }
    # ReconstructionLoss parameter: log_theta = log(theta_init = 10.0)
    log_theta = jnp.log(jnp.float32(10.0))

    # gene_tile=128 -> grid (2 passes, 4 gene tiles) to exercise the pipeline.
    loss_fn = jax.jit(functools.partial(stage1_total_loss, gene_tile=128))

    # 1) module default: uniform similarity (similarity_matrix=None)
    losses = loss_fn(outputs, targets, model_params, log_theta)
    jax.block_until_ready(losses['total'])
    ref = _reference(outputs, targets, model_params, log_theta)
    for k in ('reconstruction_total', 'velocity_coherence_total',
              'regularization_total', 'total'):
        assert jnp.allclose(losses[k], ref[k], rtol=2e-3, atol=1e-2), (
            k, float(losses[k]), float(ref[k]))

    # 2) explicit similarity-matrix path (bf16 MXU sim @ vn per tile)
    sim = jax.random.uniform(ks[9], (B, B)) / B
    losses_s = loss_fn(outputs, targets, model_params, log_theta,
                       similarity_matrix=sim)
    jax.block_until_ready(losses_s['total'])
    ref_s = _reference(outputs, targets, model_params, log_theta,
                       similarity_matrix=sim)
    assert jnp.allclose(losses_s['velocity_coherence_magnitude'],
                        ref_s['velocity_coherence_magnitude'],
                        rtol=2e-3, atol=1e-2), (
        float(losses_s['velocity_coherence_magnitude']),
        float(ref_s['velocity_coherence_magnitude']))
    assert jnp.allclose(losses_s['velocity_coherence_direction'],
                        ref_s['velocity_coherence_direction'],
                        rtol=1e-2, atol=5e-2), (
        float(losses_s['velocity_coherence_direction']),
        float(ref_s['velocity_coherence_direction']))
    assert jnp.allclose(losses_s['total'], ref_s['total'], rtol=2e-3, atol=5e-2), (
        float(losses_s['total']), float(ref_s['total']))

    print("KERNEL_OK")
</pallas_src>

<mosaic_0001>
module attributes {stable_mosaic.version = 11 : i64} {
  func.func @kernel(%arg0: i32, %arg1: i32, %arg2: memref<3xf32, #tpu.memory_space<smem>>, %arg3: memref<8x128xf32, #tpu.memory_space<vmem>>, %arg4: memref<8x128xf32, #tpu.memory_space<vmem>>, %arg5: memref<8x128xf32, #tpu.memory_space<vmem>>, %arg6: memref<8x128xf32, #tpu.memory_space<vmem>>, %arg7: memref<8x128xf32, #tpu.memory_space<vmem>>, %arg8: memref<264x128xf32, #tpu.memory_space<vmem>>, %arg9: memref<512x128xf32, #tpu.memory_space<vmem>>, %arg10: memref<1x128xf32, #tpu.memory_space<vmem>>, %arg11: memref<8x1xf32, #tpu.memory_space<vmem>>, %arg12: memref<8x1xf32, #tpu.memory_space<vmem>>, %arg13: memref<1x1xf32, #tpu.memory_space<vmem>>, %arg14: memref<1x1xf32, #tpu.memory_space<vmem>>, %arg15: memref<1x1xf32, #tpu.memory_space<vmem>>, %arg16: memref<1x1xf32, #tpu.memory_space<vmem>>, %arg17: memref<1x1xf32, #tpu.memory_space<vmem>>, %arg18: memref<1x1xf32, #tpu.memory_space<vmem>>) attributes {dimension_semantics = [#tpu.dimension_semantics<arbitrary>, #tpu.dimension_semantics<arbitrary>], iteration_bounds = array<i64: 2, 4>, scalar_prefetch = 0 : i64, scratch_operands = 7 : i64, tpu.core_type = #tpu.core_type<tc>, window_params = [{transform_indices = @transform_0, window_bounds = array<i64: 3>}, {transform_indices = @transform_1, window_bounds = array<i64: 8, 128>}, {transform_indices = @transform_2, window_bounds = array<i64: 8, 128>}, {transform_indices = @transform_3, window_bounds = array<i64: 8, 128>}, {transform_indices = @transform_4, window_bounds = array<i64: 8, 128>}, {transform_indices = @transform_5, window_bounds = array<i64: 8, 128>}, {pipeline_mode = #tpu.pipeline_mode<synchronous>, transform_indices = @transform_6, window_bounds = array<i64: 264, 128>}, {transform_indices = @transform_7, window_bounds = array<i64: 512, 128>}, {pipeline_mode = #tpu.pipeline_mode<synchronous>, transform_indices = @transform_8, window_bounds = array<i64: 1, 128>}, {pipeline_mode = #tpu.pipeline_mode<synchronous>, transform_indices = @transform_9, window_bounds = array<i64: 8, 1>}]} {
    %c0 = arith.constant 0 : index
    %0 = memref.load %arg2[%c0] : memref<3xf32, #tpu.memory_space<smem>>
    %c1 = arith.constant 1 : index
    %1 = memref.load %arg2[%c1] : memref<3xf32, #tpu.memory_space<smem>>
    %c2 = arith.constant 2 : index
    %2 = memref.load %arg2[%c2] : memref<3xf32, #tpu.memory_space<smem>>
    %c0_i32 = arith.constant 0 : i32
    %3 = arith.cmpi eq, %arg0, %c0_i32 : i32
    %c0_i32_0 = arith.constant 0 : i32
    %4 = arith.cmpi eq, %arg1, %c0_i32_0 : i32
    %5 = arith.andi %3, %4 : i1
    %6 = arith.extui %5 : i1 to i32
    %c0_i32_1 = arith.constant 0 : i32
    %7 = arith.cmpi ne, %6, %c0_i32_1 : i32
    scf.if %7 {
      %cst = arith.constant 0.000000e+00 : f32
      %19 = vector.broadcast %cst : f32 to vector<8x1xf32>
      %c0_7 = arith.constant 0 : index
      %c0_8 = arith.constant 0 : index
      %20 = vector.load %arg12[%c0_7, %c0_8] : memref<8x1xf32, #tpu.memory_space<vmem>>, vector<8x1xf32>
      tpu.vector_store %arg12[%c0_7, %c0_8], %19 {strides = array<i32>} : memref<8x1xf32, #tpu.memory_space<vmem>>, vector<8x1xf32>,
      %cst_9 = arith.constant 0.000000e+00 : f32
      %21 = vector.broadcast %cst_9 : f32 to vector<1x1xf32>
      %c0_10 = arith.constant 0 : index
      %c0_11 = arith.constant 0 : index
      %22 = vector.load %arg13[%c0_10, %c0_11] : memref<1x1xf32, #tpu.memory_space<vmem>>, vector<1x1xf32>
      tpu.vector_store %arg13[%c0_10, %c0_11], %21 {strides = array<i32>} : memref<1x1xf32, #tpu.memory_space<vmem>>, vector<1x1xf32>,
      %cst_12 = arith.constant 0.000000e+00 : f32
      %23 = vector.broadcast %cst_12 : f32 to vector<1x1xf32>
      %c0_13 = arith.constant 0 : index
      %c0_14 = arith.constant 0 : index
      %24 = vector.load %arg14[%c0_13, %c0_14] : memref<1x1xf32, #tpu.memory_space<vmem>>, vector<1x1xf32>
      tpu.vector_store %arg14[%c0_13, %c0_14], %23 {strides = array<i32>} : memref<1x1xf32, #tpu.memory_space<vmem>>, vector<1x1xf32>,
      %cst_15 = arith.constant 0.000000e+00 : f32
      %25 = vector.broadcast %cst_15 : f32 to vector<1x1xf32>
      %c0_16 = arith.constant 0 : index
      %c0_17 = arith.constant 0 : index
      %26 = vector.load %arg15[%c0_16, %c0_17] : memref<1x1xf32, #tpu.memory_space<vmem>>, vector<1x1xf32>
      tpu.vector_store %arg15[%c0_16, %c0_17], %25 {strides = array<i32>} : memref<1x1xf32, #tpu.memory_space<vmem>>, vector<1x1xf32>,
      %cst_18 = arith.constant 0.000000e+00 : f32
      %27 = vector.broadcast %cst_18 : f32 to vector<1x1xf32>
      %c0_19 = arith.constant 0 : index
      %c0_20 = arith.constant 0 : index
      %28 = vector.load %arg16[%c0_19, %c0_20] : memref<1x1xf32, #tpu.memory_space<vmem>>, vector<1x1xf32>
      tpu.vector_store %arg16[%c0_19, %c0_20], %27 {strides = array<i32>} : memref<1x1xf32, #tpu.memory_space<vmem>>, vector<1x1xf32>,
      %cst_21 = arith.constant 0.000000e+00 : f32
      %29 = vector.broadcast %cst_21 : f32 to vector<1x1xf32>
      %c0_22 = arith.constant 0 : index
      %c0_23 = arith.constant 0 : index
      %30 = vector.load %arg17[%c0_22, %c0_23] : memref<1x1xf32, #tpu.memory_space<vmem>>, vector<1x1xf32>
      tpu.vector_store %arg17[%c0_22, %c0_23], %29 {strides = array<i32>} : memref<1x1xf32, #tpu.memory_space<vmem>>, vector<1x1xf32>,
      %cst_24 = arith.constant 0.000000e+00 : f32
      %31 = vector.broadcast %cst_24 : f32 to vector<1x1xf32>
      %c0_25 = arith.constant 0 : index
      %c0_26 = arith.constant 0 : index
      %32 = vector.load %arg18[%c0_25, %c0_26] : memref<1x1xf32, #tpu.memory_space<vmem>>, vector<1x1xf32>
      tpu.vector_store %arg18[%c0_25, %c0_26], %31 {strides = array<i32>} : memref<1x1xf32, #tpu.memory_space<vmem>>, vector<1x1xf32>,
    } else {
    }
    %c0_i32_2 = arith.constant 0 : i32
    %8 = arith.cmpi eq, %arg0, %c0_i32_2 : i32
    %9 = arith.extui %8 : i1 to i32
    %c0_i32_3 = arith.constant 0 : i32
    %10 = arith.cmpi ne, %9, %c0_i32_3 : i32
    scf.if %10 {
      %c0_7 = arith.constant 0 : index
      %c0_8 = arith.constant 0 : index
      %19 = vector.load %arg13[%c0_7, %c0_8] : memref<1x1xf32, #tpu.memory_space<vmem>>, vector<1x1xf32>
      %c0_9 = arith.constant 0 : index
      %c0_10 = arith.constant 0 : index
      %20 = vector.load %arg3[%c0_9, %c0_10] : memref<8x128xf32, #tpu.memory_space<vmem>>, vector<8x128xf32>
      %c0_11 = arith.constant 0 : index
      %c0_12 = arith.constant 0 : index
      %21 = vector.load %arg5[%c0_11, %c0_12] : memref<8x128xf32, #tpu.memory_space<vmem>>, vector<8x128xf32>
      %cst = arith.constant 9.99999993E-9 : f32
      %22 = vector.broadcast %cst : f32 to vector<8x128xf32>
      %23 = arith.maximumf %20, %22 : vector<8x128xf32>
      %24 = math.log %23 : vector<8x128xf32>
      %25 = vector.broadcast %0 : f32 to vector<8x128xf32>
      %26 = arith.addf %25, %23 : vector<8x128xf32>
      %27 = math.log %26 : vector<8x128xf32>
      %28 = arith.subf %24, %27 : vector<8x128xf32>
      %29 = vector.broadcast %0 : f32 to vector<8x128xf32>
      %30 = arith.mulf %29, %28 : vector<8x128xf32>
      %31 = vector.broadcast %1 : f32 to vector<8x128xf32>
      %32 = arith.subf %31, %27 : vector<8x128xf32>
      %33 = arith.mulf %21, %32 : vector<8x128xf32>
      %34 = arith.addf %30, %33 : vector<8x128xf32>
      %35 = vector.broadcast %0 : f32 to vector<8x128xf32>
      %36 = arith.addf %35, %21 : vector<8x128xf32>
      %cst_13 = arith.constant 4.000000e+00 : f32
      %37 = vector.broadcast %cst_13 : f32 to vector<8x128xf32>
      %38 = arith.addf %36, %37 : vector<8x128xf32>
      %39 = tpu.reciprocal %38 {approx = true} : vector<8x128xf32> -> vector<8x128xf32>
      %40 = arith.mulf %39, %39 : vector<8x128xf32>
      %cst_14 = arith.constant 7.93650805E-4 : f32
      %41 = vector.broadcast %cst_14 : f32 to vector<8x128xf32>
      %42 = arith.mulf %40, %41 : vector<8x128xf32>
      %cst_15 = arith.constant 0.00277777785 : f32
      %43 = vector.broadcast %cst_15 : f32 to vector<8x128xf32>
      %44 = arith.subf %43, %42 : vector<8x128xf32>
      %45 = arith.mulf %40, %44 : vector<8x128xf32>
      %cst_16 = arith.constant 0.0833333358 : f32
      %46 = vector.broadcast %cst_16 : f32 to vector<8x128xf32>
      %47 = arith.subf %46, %45 : vector<8x128xf32>
      %48 = arith.mulf %39, %47 : vector<8x128xf32>
      %cst_17 = arith.constant 5.000000e-01 : f32
      %49 = vector.broadcast %cst_17 : f32 to vector<8x128xf32>
      %50 = arith.subf %38, %49 : vector<8x128xf32>
      %51 = math.log %38 : vector<8x128xf32>
      %52 = arith.mulf %50, %51 : vector<8x128xf32>
      %53 = arith.subf %52, %38 : vector<8x128xf32>
      %cst_18 = arith.constant 0.918938517 : f32
      %54 = vector.broadcast %cst_18 : f32 to vector<8x128xf32>
      %55 = arith.addf %53, %54 : vector<8x128xf32>
      %56 = arith.addf %55, %48 : vector<8x128xf32>
      %cst_19 = arith.constant 1.000000e+00 : f32
      %57 = vector.broadcast %cst_19 : f32 to vector<8x128xf32>
      %58 = arith.addf %36, %57 : vector<8x128xf32>
      %59 = arith.mulf %36, %58 : vector<8x128xf32>
      %cst_20 = arith.constant 2.000000e+00 : f32
      %60 = vector.broadcast %cst_20 : f32 to vector<8x128xf32>
      %61 = arith.addf %36, %60 : vector<8x128xf32>
      %62 = arith.mulf %59, %61 : vector<8x128xf32>
      %cst_21 = arith.constant 3.000000e+00 : f32
      %63 = vector.broadcast %cst_21 : f32 to vector<8x128xf32>
      %64 = arith.addf %36, %63 : vector<8x128xf32>
      %65 = arith.mulf %62, %64 : vector<8x128xf32>
      %66 = math.log %65 : vector<8x128xf32>
      %67 = arith.subf %56, %66 : vector<8x128xf32>
      %68 = arith.addf %34, %67 : vector<8x128xf32>
      %cst_22 = arith.constant 1.000000e+00 : f32
      %69 = vector.broadcast %cst_22 : f32 to vector<8x128xf32>
      %70 = arith.addf %69, %21 : vector<8x128xf32>
      %cst_23 = arith.constant 4.000000e+00 : f32
      %71 = vector.broadcast %cst_23 : f32 to vector<8x128xf32>
      %72 = arith.addf %70, %71 : vector<8x128xf32>
      %73 = tpu.reciprocal %72 {approx = true} : vector<8x128xf32> -> vector<8x128xf32>
      %74 = arith.mulf %73, %73 : vector<8x128xf32>
      %cst_24 = arith.constant 7.93650805E-4 : f32
      %75 = vector.broadcast %cst_24 : f32 to vector<8x128xf32>
      %76 = arith.mulf %74, %75 : vector<8x128xf32>
      %cst_25 = arith.constant 0.00277777785 : f32
      %77 = vector.broadcast %cst_25 : f32 to vector<8x128xf32>
      %78 = arith.subf %77, %76 : vector<8x128xf32>
      %79 = arith.mulf %74, %78 : vector<8x128xf32>
      %cst_26 = arith.constant 0.0833333358 : f32
      %80 = vector.broadcast %cst_26 : f32 to vector<8x128xf32>
      %81 = arith.subf %80, %79 : vector<8x128xf32>
      %82 = arith.mulf %73, %81 : vector<8x128xf32>
      %cst_27 = arith.constant 5.000000e-01 : f32
      %83 = vector.broadcast %cst_27 : f32 to vector<8x128xf32>
      %84 = arith.subf %72, %83 : vector<8x128xf32>
      %85 = math.log %72 : vector<8x128xf32>
      %86 = arith.mulf %84, %85 : vector<8x128xf32>
      %87 = arith.subf %86, %72 : vector<8x128xf32>
      %cst_28 = arith.constant 0.918938517 : f32
      %88 = vector.broadcast %cst_28 : f32 to vector<8x128xf32>
      %89 = arith.addf %87, %88 : vector<8x128xf32>
      %90 = arith.addf %89, %82 : vector<8x128xf32>
      %cst_29 = arith.constant 1.000000e+00 : f32
      %91 = vector.broadcast %cst_29 : f32 to vector<8x128xf32>
      %92 = arith.addf %70, %91 : vector<8x128xf32>
      %93 = arith.mulf %70, %92 : vector<8x128xf32>
      %cst_30 = arith.constant 2.000000e+00 : f32
      %94 = vector.broadcast %cst_30 : f32 to vector<8x128xf32>
      %95 = arith.addf %70, %94 : vector<8x128xf32>
      %96 = arith.mulf %93, %95 : vector<8x128xf32>
      %cst_31 = arith.constant 3.000000e+00 : f32
      %97 = vector.broadcast %cst_31 : f32 to vector<8x128xf32>
      %98 = arith.addf %70, %97 : vector<8x128xf32>
      %99 = arith.mulf %96, %98 : vector<8x128xf32>
      %100 = math.log %99 : vector<8x128xf32>
      %101 = arith.subf %90, %100 : vector<8x128xf32>
      %102 = arith.subf %68, %101 : vector<8x128xf32>
      %cst_32 = arith.constant dense<0.000000e+00> : vector<8xf32>
      %103 = vector.multi_reduction <add>, %102, %cst_32 [1] : vector<8x128xf32> to vector<8xf32>
      %104 = vector.shape_cast %103 : vector<8xf32> to vector<8x1xf32>
      %cst_33 = arith.constant dense<0.000000e+00> : vector<1xf32>
      %105 = vector.multi_reduction <add>, %104, %cst_33 [0] : vector<8x1xf32> to vector<1xf32>
      %106 = vector.shape_cast %105 : vector<1xf32> to vector<1x1xf32>
      %107 = arith.addf %19, %106 : vector<1x1xf32>
      %c0_34 = arith.constant 0 : index
      %c0_35 = arith.constant 0 : index
      %108 = vector.load %arg13[%c0_34, %c0_35] : memref<1x1xf32, #tpu.memory_space<vmem>>, vector<1x1xf32>
      tpu.vector_store %arg13[%c0_34, %c0_35], %107 {strides = array<i32>} : memref<1x1xf32, #tpu.memory_space<vmem>>, vector<1x1xf32>,
      %c0_36 = arith.constant 0 : index
      %c0_37 = arith.constant 0 : index
      %109 = vector.load %arg14[%c0_36, %c0_37] : memref<1x1xf32, #tpu.memory_space<vmem>>, vector<1x1xf32>
      %c0_38 = arith.constant 0 : index
      %c0_39 = arith.constant 0 : index
      %110 = vector.load %arg4[%c0_38, %c0_39] : memref<8x128xf32, #tpu.memory_space<vmem>>, vector<8x128xf32>
      %c0_40 = arith.constant 0 : index
      %c0_41 = arith.constant 0 : index
      %111 = vector.load %arg6[%c0_40, %c0_41] : memref<8x128xf32, #tpu.memory_space<vmem>>, vector<8x128xf32>
      %cst_42 = arith.constant 9.99999993E-9 : f32
      %112 = vector.broadcast %cst_42 : f32 to vector<8x128xf32>
      %113 = arith.maximumf %110, %112 : vector<8x128xf32>
      %114 = math.log %113 : vector<8x128xf32>
      %115 = vector.broadcast %0 : f32 to vector<8x128xf32>
      %116 = arith.addf %115, %113 : vector<8x128xf32>
      %117 = math.log %116 : vector<8x128xf32>
      %118 = arith.subf %114, %117 : vector<8x128xf32>
      %119 = vector.broadcast %0 : f32 to vector<8x128xf32>
      %120 = arith.mulf %119, %118 : vector<8x128xf32>
      %121 = vector.broadcast %1 : f32 to vector<8x128xf32>
      %122 = arith.subf %121, %117 : vector<8x128xf32>
      %123 = arith.mulf %111, %122 : vector<8x128xf32>
      %124 = arith.addf %120, %123 : vector<8x128xf32>
      %125 = vector.broadcast %0 : f32 to vector<8x128xf32>
      %126 = arith.addf %125, %111 : vector<8x128xf32>
      %cst_43 = arith.constant 4.000000e+00 : f32
      %127 = vector.broadcast %cst_43 : f32 to vector<8x128xf32>
      %128 = arith.addf %126, %127 : vector<8x128xf32>
      %129 = tpu.reciprocal %128 {approx = true} : vector<8x128xf32> -> vector<8x128xf32>
      %130 = arith.mulf %129, %129 : vector<8x128xf32>
      %cst_44 = arith.constant 7.93650805E-4 : f32
      %131 = vector.broadcast %cst_44 : f32 to vector<8x128xf32>
      %132 = arith.mulf %130, %131 : vector<8x128xf32>
      %cst_45 = arith.constant 0.00277777785 : f32
      %133 = vector.broadcast %cst_45 : f32 to vector<8x128xf32>
      %134 = arith.subf %133, %132 : vector<8x128xf32>
      %135 = arith.mulf %130, %134 : vector<8x128xf32>
      %cst_46 = arith.constant 0.0833333358 : f32
      %136 = vector.broadcast %cst_46 : f32 to vector<8x128xf32>
      %137 = arith.subf %136, %135 : vector<8x128xf32>
      %138 = arith.mulf %129, %137 : vector<8x128xf32>
      %cst_47 = arith.constant 5.000000e-01 : f32
      %139 = vector.broadcast %cst_47 : f32 to vector<8x128xf32>
      %140 = arith.subf %128, %139 : vector<8x128xf32>
      %141 = math.log %128 : vector<8x128xf32>
      %142 = arith.mulf %140, %141 : vector<8x128xf32>
      %143 = arith.subf %142, %128 : vector<8x128xf32>
      %cst_48 = arith.constant 0.918938517 : f32
      %144 = vector.broadcast %cst_48 : f32 to vector<8x128xf32>
      %145 = arith.addf %143, %144 : vector<8x128xf32>
      %146 = arith.addf %145, %138 : vector<8x128xf32>
      %cst_49 = arith.constant 1.000000e+00 : f32
      %147 = vector.broadcast %cst_49 : f32 to vector<8x128xf32>
      %148 = arith.addf %126, %147 : vector<8x128xf32>
      %149 = arith.mulf %126, %148 : vector<8x128xf32>
      %cst_50 = arith.constant 2.000000e+00 : f32
      %150 = vector.broadcast %cst_50 : f32 to vector<8x128xf32>
      %151 = arith.addf %126, %150 : vector<8x128xf32>
      %152 = arith.mulf %149, %151 : vector<8x128xf32>
      %cst_51 = arith.constant 3.000000e+00 : f32
      %153 = vector.broadcast %cst_51 : f32 to vector<8x128xf32>
      %154 = arith.addf %126, %153 : vector<8x128xf32>
      %155 = arith.mulf %152, %154 : vector<8x128xf32>
      %156 = math.log %155 : vector<8x128xf32>
      %157 = arith.subf %146, %156 : vector<8x128xf32>
      %158 = arith.addf %124, %157 : vector<8x128xf32>
      %cst_52 = arith.constant 1.000000e+00 : f32
      %159 = vector.broadcast %cst_52 : f32 to vector<8x128xf32>
      %160 = arith.addf %159, %111 : vector<8x128xf32>
      %cst_53 = arith.constant 4.000000e+00 : f32
      %161 = vector.broadcast %cst_53 : f32 to vector<8x128xf32>
      %162 = arith.addf %160, %161 : vector<8x128xf32>
      %163 = tpu.reciprocal %162 {approx = true} : vector<8x128xf32> -> vector<8x128xf32>
      %164 = arith.mulf %163, %163 : vector<8x128xf32>
      %cst_54 = arith.constant 7.93650805E-4 : f32
      %165 = vector.broadcast %cst_54 : f32 to vector<8x128xf32>
      %166 = arith.mulf %164, %165 : vector<8x128xf32>
      %cst_55 = arith.constant 0.00277777785 : f32
      %167 = vector.broadcast %cst_55 : f32 to vector<8x128xf32>
      %168 = arith.subf %167, %166 : vector<8x128xf32>
      %169 = arith.mulf %164, %168 : vector<8x128xf32>
      %cst_56 = arith.constant 0.0833333358 : f32
      %170 = vector.broadcast %cst_56 : f32 to vector<8x128xf32>
      %171 = arith.subf %170, %169 : vector<8x128xf32>
      %172 = arith.mulf %163, %171 : vector<8x128xf32>
      %cst_57 = arith.constant 5.000000e-01 : f32
      %173 = vector.broadcast %cst_57 : f32 to vector<8x128xf32>
      %174 = arith.subf %162, %173 : vector<8x128xf32>
      %175 = math.log %162 : vector<8x128xf32>
      %176 = arith.mulf %174, %175 : vector<8x128xf32>
      %177 = arith.subf %176, %162 : vector<8x128xf32>
      %cst_58 = arith.constant 0.918938517 : f32
      %178 = vector.broadcast %cst_58 : f32 to vector<8x128xf32>
      %179 = arith.addf %177, %178 : vector<8x128xf32>
      %180 = arith.addf %179, %172 : vector<8x128xf32>
      %cst_59 = arith.constant 1.000000e+00 : f32
      %181 = vector.broadcast %cst_59 : f32 to vector<8x128xf32>
      %182 = arith.addf %160, %181 : vector<8x128xf32>
      %183 = arith.mulf %160, %182 : vector<8x128xf32>
      %cst_60 = arith.constant 2.000000e+00 : f32
      %184 = vector.broadcast %cst_60 : f32 to vector<8x128xf32>
      %185 = arith.addf %160, %184 : vector<8x128xf32>
      %186 = arith.mulf %183, %185 : vector<8x128xf32>
      %cst_61 = arith.constant 3.000000e+00 : f32
      %187 = vector.broadcast %cst_61 : f32 to vector<8x128xf32>
      %188 = arith.addf %160, %187 : vector<8x128xf32>
      %189 = arith.mulf %186, %188 : vector<8x128xf32>
      %190 = math.log %189 : vector<8x128xf32>
      %191 = arith.subf %180, %190 : vector<8x128xf32>
      %192 = arith.subf %158, %191 : vector<8x128xf32>
      %cst_62 = arith.constant dense<0.000000e+00> : vector<8xf32>
      %193 = vector.multi_reduction <add>, %192, %cst_62 [1] : vector<8x128xf32> to vector<8xf32>
      %194 = vector.shape_cast %193 : vector<8xf32> to vector<8x1xf32>
      %cst_63 = arith.constant dense<0.000000e+00> : vector<1xf32>
      %195 = vector.multi_reduction <add>, %194, %cst_63 [0] : vector<8x1xf32> to vector<1xf32>
      %196 = vector.shape_cast %195 : vector<1xf32> to vector<1x1xf32>
      %197 = arith.addf %109, %196 : vector<1x1xf32>
      %c0_64 = arith.constant 0 : index
      %c0_65 = arith.constant 0 : index
      %198 = vector.load %arg14[%c0_64, %c0_65] : memref<1x1xf32, #tpu.memory_space<vmem>>, vector<1x1xf32>
      tpu.vector_store %arg14[%c0_64, %c0_65], %197 {strides = array<i32>} : memref<1x1xf32, #tpu.memory_space<vmem>>, vector<1x1xf32>,
      %c0_66 = arith.constant 0 : index
      %c0_67 = arith.constant 0 : index
      %199 = vector.load %arg7[%c0_66, %c0_67] : memref<8x128xf32, #tpu.memory_space<vmem>>, vector<8x128xf32>
      %c0_68 = arith.constant 0 : index
      %c0_69 = arith.constant 0 : index
      %200 = vector.load %arg12[%c0_68, %c0_69] : memref<8x1xf32, #tpu.memory_space<vmem>>, vector<8x1xf32>
      %201 = arith.mulf %199, %199 : vector<8x128xf32>
      %cst_70 = arith.constant dense<0.000000e+00> : vector<8xf32>
      %202 = vector.multi_reduction <add>, %201, %cst_70 [1] : vector<8x128xf32> to vector<8xf32>
      %203 = vector.shape_cast %202 : vector<8xf32> to vector<8x1xf32>
      %204 = arith.addf %200, %203 : vector<8x1xf32>
      %c0_71 = arith.constant 0 : index
      %c0_72 = arith.constant 0 : index
      %205 = vector.load %arg12[%c0_71, %c0_72] : memref<8x1xf32, #tpu.memory_space<vmem>>, vector<8x1xf32>
      tpu.vector_store %arg12[%c0_71, %c0_72], %204 {strides = array<i32>} : memref<8x1xf32, #tpu.memory_space<vmem>>, vector<8x1xf32>,
      %c0_73 = arith.constant 0 : index
      %c0_74 = arith.constant 0 : index
      %206 = vector.load %arg9[%c0_73, %c0_74] : memref<512x128xf32, #tpu.memory_space<vmem>>, vector<512x128xf32>
      %207 = math.absf %206 : vector<512x128xf32>
      %cst_75 = arith.constant dense<0.000000e+00> : vector<512xf32>
      %208 = vector.multi_reduction <add>, %207, %cst_75 [1] : vector<512x128xf32> to vector<512xf32>
      %209 = vector.shape_cast %208 : vector<512xf32> to vector<512x1xf32>
      %cst_76 = arith.constant dense<0.000000e+00> : vector<1xf32>
      %210 = vector.multi_reduction <add>, %209, %cst_76 [0] : vector<512x1xf32> to vector<1xf32>
      %211 = vector.shape_cast %210 : vector<1xf32> to vector<1x1xf32>
      %c0_77 = arith.constant 0 : index
      %c0_78 = arith.constant 0 : index
      %212 = vector.load %arg15[%c0_77, %c0_78] : memref<1x1xf32, #tpu.memory_space<vmem>>, vector<1x1xf32>
      %213 = arith.addf %212, %211 : vector<1x1xf32>
      %c0_79 = arith.constant 0 : index
      %c0_80 = arith.constant 0 : index
      %214 = vector.load %arg15[%c0_79, %c0_80] : memref<1x1xf32, #tpu.memory_space<vmem>>, vector<1x1xf32>
      tpu.vector_store %arg15[%c0_79, %c0_80], %213 {strides = array<i32>} : memref<1x1xf32, #tpu.memory_space<vmem>>, vector<1x1xf32>,
      %c0_81 = arith.constant 0 : index
      %c0_82 = arith.constant 0 : index
      %215 = vector.load %arg17[%c0_81, %c0_82] : memref<1x1xf32, #tpu.memory_space<vmem>>, vector<1x1xf32>
      %216 = arith.addf %215, %211 : vector<1x1xf32>
      %c0_83 = arith.constant 0 : index
      %c0_84 = arith.constant 0 : index
      %217 = vector.load %arg17[%c0_83, %c0_84] : memref<1x1xf32, #tpu.memory_space<vmem>>, vector<1x1xf32>
      tpu.vector_store %arg17[%c0_83, %c0_84], %216 {strides = array<i32>} : memref<1x1xf32, #tpu.memory_space<vmem>>, vector<1x1xf32>,
      %c0_85 = arith.constant 0 : index
      %c0_86 = arith.constant 0 : index
      %218 = vector.load %arg16[%c0_85, %c0_86] : memref<1x1xf32, #tpu.memory_space<vmem>>, vector<1x1xf32>
      %219 = arith.mulf %206, %206 : vector<512x128xf32>
      %cst_87 = arith.constant dense<0.000000e+00> : vector<512xf32>
      %220 = vector.multi_reduction <add>, %219, %cst_87 [1] : vector<512x128xf32> to vector<512xf32>
      %221 = vector.shape_cast %220 : vector<512xf32> to vector<512x1xf32>
      %cst_88 = arith.constant dense<0.000000e+00> : vector<1xf32>
      %222 = vector.multi_reduction <add>, %221, %cst_88 [0] : vector<512x1xf32> to vector<1xf32>
      %223 = vector.shape_cast %222 : vector<1xf32> to vector<1x1xf32>
      %224 = arith.addf %218, %223 : vector<1x1xf32>
      %c0_89 = arith.constant 0 : index
      %c0_90 = arith.constant 0 : index
      %225 = vector.load %arg16[%c0_89, %c0_90] : memref<1x1xf32, #tpu.memory_space<vmem>>, vector<1x1xf32>
      tpu.vector_store %arg16[%c0_89, %c0_90], %224 {strides = array<i32>} : memref<1x1xf32, #tpu.memory_space<vmem>>, vector<1x1xf32>,
      %c0_i32_91 = arith.constant 0 : i32
      %226 = arith.cmpi eq, %arg1, %c0_i32_91 : i32
      %227 = arith.extui %226 : i1 to i32
      %c0_i32_92 = arith.constant 0 : i32
      %228 = arith.cmpi ne, %227, %c0_i32_92 : i32
      scf.if %228 {
        %c0_93 = arith.constant 0 : index
        %c0_94 = arith.constant 0 : index
        %229 = vector.load %arg8[%c0_93, %c0_94] : memref<264x128xf32, #tpu.memory_space<vmem>>, vector<264x128xf32>
        %230 = math.absf %229 : vector<264x128xf32>
        %c0_95 = arith.constant 0 : index
        %c0_96 = arith.constant 0 : index
        %231 = vector.load %arg15[%c0_95, %c0_96] : memref<1x1xf32, #tpu.memory_space<vmem>>, vector<1x1xf32>
        %cst_97 = arith.constant dense<0.000000e+00> : vector<264xf32>
        %232 = vector.multi_reduction <add>, %230, %cst_97 [1] : vector<264x128xf32> to vector<264xf32>
        %233 = vector.shape_cast %232 : vector<264xf32> to vector<264x1xf32>
        %cst_98 = arith.constant dense<0.000000e+00> : vector<1xf32>
        %234 = vector.multi_reduction <add>, %233, %cst_98 [0] : vector<264x1xf32> to vector<1xf32>
        %235 = vector.shape_cast %234 : vector<1xf32> to vector<1x1xf32>
        %236 = arith.addf %231, %235 : vector<1x1xf32>
        %c0_99 = arith.constant 0 : index
        %c0_100 = arith.constant 0 : index
        %237 = vector.load %arg15[%c0_99, %c0_100] : memref<1x1xf32, #tpu.memory_space<vmem>>, vector<1x1xf32>
        tpu.vector_store %arg15[%c0_99, %c0_100], %236 {strides = array<i32>} : memref<1x1xf32, #tpu.memory_space<vmem>>, vector<1x1xf32>,
        %c0_101 = arith.constant 0 : index
        %c0_102 = arith.constant 0 : index
        %238 = vector.load %arg16[%c0_101, %c0_102] : memref<1x1xf32, #tpu.memory_space<vmem>>, vector<1x1xf32>
        %239 = arith.mulf %229, %229 : vector<264x128xf32>
        %cst_103 = arith.constant dense<0.000000e+00> : vector<264xf32>
        %240 = vector.multi_reduction <add>, %239, %cst_103 [1] : vector<264x128xf32> to vector<264xf32>
        %241 = vector.shape_cast %240 : vector<264xf32> to vector<264x1xf32>
        %cst_104 = arith.constant dense<0.000000e+00> : vector<1xf32>
        %242 = vector.multi_reduction <add>, %241, %cst_104 [0] : vector<264x1xf32> to vector<1xf32>
        %243 = vector.shape_cast %242 : vector<1xf32> to vector<1x1xf32>
        %244 = arith.addf %238, %243 : vector<1x1xf32>
        %c0_105 = arith.constant 0 : index
        %c0_106 = arith.constant 0 : index
        %245 = vector.load %arg16[%c0_105, %c0_106] : memref<1x1xf32, #tpu.memory_space<vmem>>, vector<1x1xf32>
        tpu.vector_store %arg16[%c0_105, %c0_106], %244 {strides = array<i32>} : memref<1x1xf32, #tpu.memory_space<vmem>>, vector<1x1xf32>,
      } else {
      }
    } else {
    }
    %c1_i32 = arith.constant 1 : i32
    %11 = arith.cmpi eq, %arg0, %c1_i32 : i32
    %12 = arith.extui %11 : i1 to i32
    %c0_i32_4 = arith.constant 0 : i32
    %13 = arith.cmpi ne, %12, %c0_i32_4 : i32
    scf.if %13 {
      %c0_7 = arith.constant 0 : index
      %c0_8 = arith.constant 0 : index
      %19 = vector.load %arg7[%c0_7, %c0_8] : memref<8x128xf32, #tpu.memory_space<vmem>>, vector<8x128xf32>
      %c0_9 = arith.constant 0 : index
      %c0_10 = arith.constant 0 : index
      %20 = vector.load %arg12[%c0_9, %c0_10] : memref<8x1xf32, #tpu.memory_space<vmem>>, vector<8x1xf32>
      %21 = math.sqrt %20 : vector<8x1xf32>
      %cst = arith.constant 9.99999996E-13 : f32
      %22 = vector.broadcast %cst : f32 to vector<8x1xf32>
      %23 = arith.maximumf %21, %22 : vector<8x1xf32>
      %24 = tpu.reciprocal %23 : vector<8x1xf32> -> vector<8x1xf32>
      %25 = vector.broadcast %24 : vector<8x1xf32> to vector<8x128xf32>
      %26 = arith.mulf %19, %25 : vector<8x128xf32>
      %cst_11 = arith.constant dense<0.000000e+00> : vector<128xf32>
      %27 = vector.multi_reduction <add>, %26, %cst_11 [0] : vector<8x128xf32> to vector<128xf32>
      %28 = vector.shape_cast %27 : vector<128xf32> to vector<1x128xf32>
      %c0_12 = arith.constant 0 : index
      %c0_13 = arith.constant 0 : index
      %29 = vector.load %arg18[%c0_12, %c0_13] : memref<1x1xf32, #tpu.memory_space<vmem>>, vector<1x1xf32>
      %30 = arith.mulf %28, %28 : vector<1x128xf32>
      %cst_14 = arith.constant dense<0.000000e+00> : vector<1xf32>
      %31 = vector.multi_reduction <add>, %30, %cst_14 [1] : vector<1x128xf32> to vector<1xf32>
      %32 = vector.shape_cast %31 : vector<1xf32> to vector<1x1xf32>
      %33 = arith.addf %29, %32 : vector<1x1xf32>
      %c0_15 = arith.constant 0 : index
      %c0_16 = arith.constant 0 : index
      %34 = vector.load %arg18[%c0_15, %c0_16] : memref<1x1xf32, #tpu.memory_space<vmem>>, vector<1x1xf32>
      tpu.vector_store %arg18[%c0_15, %c0_16], %33 {strides = array<i32>} : memref<1x1xf32, #tpu.memory_space<vmem>>, vector<1x1xf32>,
    } else {
    }
    %c1_i32_5 = arith.constant 1 : i32
    %14 = arith.cmpi eq, %arg0, %c1_i32_5 : i32
    %c3_i32 = arith.constant 3 : i32
    %15 = arith.cmpi eq, %arg1, %c3_i32 : i32
    %16 = arith.andi %14, %15 : i1
    %17 = arith.extui %16 : i1 to i32
    %c0_i32_6 = arith.constant 0 : i32
    %18 = arith.cmpi ne, %17, %c0_i32_6 : i32
    scf.if %18 {
      %c0_7 = arith.constant 0 : index
      %c0_8 = arith.constant 0 : index
      %19 = vector.load %arg13[%c0_7, %c0_8] : memref<1x1xf32, #tpu.memory_space<vmem>>, vector<1x1xf32>
      %cst = arith.constant -1.250000e-01 : f32
      %20 = vector.broadcast %cst : f32 to vector<1x1xf32>
      %21 = arith.mulf %20, %19 : vector<1x1xf32>
      %cst_9 = arith.constant 5.120000e+02 : f32
      %22 = arith.mulf %cst_9, %2 : f32
      %23 = vector.broadcast %22 : f32 to vector<1x1xf32>
      %24 = arith.addf %21, %23 : vector<1x1xf32>
      %c0_10 = arith.constant 0 : index
      %c0_11 = arith.constant 0 : index
      %25 = vector.load %arg14[%c0_10, %c0_11] : memref<1x1xf32, #tpu.memory_space<vmem>>, vector<1x1xf32>
      %cst_12 = arith.constant -1.250000e-01 : f32
      %26 = vector.broadcast %cst_12 : f32 to vector<1x1xf32>
      %27 = arith.mulf %26, %25 : vector<1x1xf32>
      %cst_13 = arith.constant 5.120000e+02 : f32
      %28 = arith.mulf %cst_13, %2 : f32
      %29 = vector.broadcast %28 : f32 to vector<1x1xf32>
      %30 = arith.addf %27, %29 : vector<1x1xf32>
      %c0_14 = arith.constant 0 : index
      %c0_15 = arith.constant 0 : index
      %31 = vector.load %arg12[%c0_14, %c0_15] : memref<8x1xf32, #tpu.memory_space<vmem>>, vector<8x1xf32>
      %32 = math.sqrt %31 : vector<8x1xf32>
      %c0_16 = arith.constant 0 : index
      %c0_17 = arith.constant 0 : index
      %33 = vector.load %arg11[%c0_16, %c0_17] : memref<8x1xf32, #tpu.memory_space<vmem>>, vector<8x1xf32>
      tpu.vector_store %arg11[%c0_16, %c0_17], %32 {strides = array<i32>} : memref<8x1xf32, #tpu.memory_space<vmem>>, vector<8x1xf32>,
      %cst_18 = arith.constant dense<0.000000e+00> : vector<1xf32>
      %34 = vector.multi_reduction <add>, %32, %cst_18 [0] : vector<8x1xf32> to vector<1xf32>
      %35 = vector.shape_cast %34 : vector<1xf32> to vector<1x1xf32>
      %cst_19 = arith.constant 1.250000e-01 : f32
      %36 = vector.broadcast %cst_19 : f32 to vector<1x1xf32>
      %37 = arith.mulf %36, %35 : vector<1x1xf32>
      %38 = vector.broadcast %37 : vector<1x1xf32> to vector<8x1xf32>
      %39 = arith.subf %32, %38 : vector<8x1xf32>
      %40 = arith.mulf %39, %39 : vector<8x1xf32>
      %cst_20 = arith.constant dense<0.000000e+00> : vector<1xf32>
      %41 = vector.multi_reduction <add>, %40, %cst_20 [0] : vector<8x1xf32> to vector<1xf32>
      %42 = vector.shape_cast %41 : vector<1xf32> to vector<1x1xf32>
      %cst_21 = arith.constant 2.000000e+00 : f32
      %43 = vector.broadcast %cst_21 : f32 to vector<1x1xf32>
      %44 = arith.mulf %43, %42 : vector<1x1xf32>
      %c0_22 = arith.constant 0 : index
      %c0_23 = arith.constant 0 : index
      %45 = vector.load %arg18[%c0_22, %c0_23] : memref<1x1xf32, #tpu.memory_space<vmem>>, vector<1x1xf32>
      %cst_24 = arith.constant 1.250000e-01 : f32
      %46 = vector.broadcast %cst_24 : f32 to vector<1x1xf32>
      %47 = arith.mulf %46, %45 : vector<1x1xf32>
      %cst_25 = arith.constant 8.000000e+00 : f32
      %48 = vector.broadcast %cst_25 : f32 to vector<1x1xf32>
      %49 = arith.subf %48, %47 : vector<1x1xf32>
      %c0_26 = arith.constant 0 : index
      %c0_27 = arith.constant 0 : index
      %50 = vector.load %arg15[%c0_26, %c0_27] : memref<1x1xf32, #tpu.memory_space<vmem>>, vector<1x1xf32>
      %c0_28 = arith.constant 0 : index
      %c0_29 = arith.constant 0 : index
      %51 = vector.load %arg16[%c0_28, %c0_29] : memref<1x1xf32, #tpu.memory_space<vmem>>, vector<1x1xf32>
      %c0_30 = arith.constant 0 : index
      %c0_31 = arith.constant 0 : index
      %52 = vector.load %arg17[%c0_30, %c0_31] : memref<1x1xf32, #tpu.memory_space<vmem>>, vector<1x1xf32>
      %53 = tpu.iota {dimensions = array<i32: 1>} : vector<1x128xi32>
      %cst_32 = arith.constant 0.000000e+00 : f32
      %54 = vector.broadcast %cst_32 : f32 to vector<1x128xf32>
      %c0_i32_33 = arith.constant 0 : i32
      %55 = vector.broadcast %c0_i32_33 : i32 to vector<1x128xi32>
      %56 = arith.cmpi eq, %53, %55 : vector<1x128xi32>
      %57 = vector.shape_cast %24 : vector<1x1xf32> to vector<1x1xf32>
      %58 = vector.broadcast %57 : vector<1x1xf32> to vector<1x128xf32>
      %59 = arith.select %56, %58, %54 : vector<1x128xi1>, vector<1x128xf32>
      %c1_i32_34 = arith.constant 1 : i32
      %60 = vector.broadcast %c1_i32_34 : i32 to vector<1x128xi32>
      %61 = arith.cmpi eq, %53, %60 : vector<1x128xi32>
      %62 = vector.shape_cast %30 : vector<1x1xf32> to vector<1x1xf32>
      %63 = vector.broadcast %62 : vector<1x1xf32> to vector<1x128xf32>
      %64 = arith.select %61, %63, %59 : vector<1x128xi1>, vector<1x128xf32>
      %c2_i32 = arith.constant 2 : i32
      %65 = vector.broadcast %c2_i32 : i32 to vector<1x128xi32>
      %66 = arith.cmpi eq, %53, %65 : vector<1x128xi32>
      %67 = vector.shape_cast %44 : vector<1x1xf32> to vector<1x1xf32>
      %68 = vector.broadcast %67 : vector<1x1xf32> to vector<1x128xf32>
      %69 = arith.select %66, %68, %64 : vector<1x128xi1>, vector<1x128xf32>
      %c3_i32_35 = arith.constant 3 : i32
      %70 = vector.broadcast %c3_i32_35 : i32 to vector<1x128xi32>
      %71 = arith.cmpi eq, %53, %70 : vector<1x128xi32>
      %72 = vector.shape_cast %49 : vector<1x1xf32> to vector<1x1xf32>
      %73 = vector.broadcast %72 : vector<1x1xf32> to vector<1x128xf32>
      %74 = arith.select %71, %73, %69 : vector<1x128xi1>, vector<1x128xf32>
      %c4_i32 = arith.constant 4 : i32
      %75 = vector.broadcast %c4_i32 : i32 to vector<1x128xi32>
      %76 = arith.cmpi eq, %53, %75 : vector<1x128xi32>
      %77 = vector.shape_cast %50 : vector<1x1xf32> to vector<1x1xf32>
      %78 = vector.broadcast %77 : vector<1x1xf32> to vector<1x128xf32>
      %79 = arith.select %76, %78, %74 : vector<1x128xi1>, vector<1x128xf32>
      %c5_i32 = arith.constant 5 : i32
      %80 = vector.broadcast %c5_i32 : i32 to vector<1x128xi32>
      %81 = arith.cmpi eq, %53, %80 : vector<1x128xi32>
      %82 = vector.shape_cast %51 : vector<1x1xf32> to vector<1x1xf32>
      %83 = vector.broadcast %82 : vector<1x1xf32> to vector<1x128xf32>
      %84 = arith.select %81, %83, %79 : vector<1x128xi1>, vector<1x128xf32>
      %c6_i32 = arith.constant 6 : i32
      %85 = vector.broadcast %c6_i32 : i32 to vector<1x128xi32>
      %86 = arith.cmpi eq, %53, %85 : vector<1x128xi32>
      %87 = vector.shape_cast %52 : vector<1x1xf32> to vector<1x1xf32>
      %88 = vector.broadcast %87 : vector<1x1xf32> to vector<1x128xf32>
      %89 = arith.select %86, %88, %84 : vector<1x128xi1>, vector<1x128xf32>
      %c0_36 = arith.constant 0 : index
      %c0_37 = arith.constant 0 : index
      %90 = vector.load %arg10[%c0_36, %c0_37] : memref<1x128xf32, #tpu.memory_space<vmem>>, vector<1x128xf32>
      tpu.vector_store %arg10[%c0_36, %c0_37], %89 {strides = array<i32>} : memref<1x128xf32, #tpu.memory_space<vmem>>, vector<1x128xf32>,
    } else {
    }
    return
  }
  func.func @transform_0(%arg0: i32, %arg1: i32) -> i32 {
    %c0_i32 = arith.constant 0 : i32
    %c0_i32_0 = arith.constant 0 : i32
    return %c0_i32 : i32
  }
  func.func @transform_1(%arg0: i32, %arg1: i32) -> (i32, i32) {
    %c1_i32 = arith.constant 1 : i32
    %0 = arith.subi %c1_i32, %arg0 : i32
    %1 = arith.muli %arg1, %0 : i32
    %c3_i32 = arith.constant 3 : i32
    %2 = arith.muli %c3_i32, %arg0 : i32
    %3 = arith.addi %1, %2 : i32
    %c0_i32 = arith.constant 0 : i32
    %c0_i32_0 = arith.constant 0 : i32
    return %c0_i32, %3 : i32, i32
  }
  func.func @transform_2(%arg0: i32, %arg1: i32) -> (i32, i32) {
    %c1_i32 = arith.constant 1 : i32
    %0 = arith.subi %c1_i32, %arg0 : i32
    %1 = arith.muli %arg1, %0 : i32
    %c3_i32 = arith.constant 3 : i32
    %2 = arith.muli %c3_i32, %arg0 : i32
    %3 = arith.addi %1, %2 : i32
    %c0_i32 = arith.constant 0 : i32
    %c0_i32_0 = arith.constant 0 : i32
    return %c0_i32, %3 : i32, i32
  }
  func.func @transform_3(%arg0: i32, %arg1: i32) -> (i32, i32) {
    %c1_i32 = arith.constant 1 : i32
    %0 = arith.subi %c1_i32, %arg0 : i32
    %1 = arith.muli %arg1, %0 : i32
    %c3_i32 = arith.constant 3 : i32
    %2 = arith.muli %c3_i32, %arg0 : i32
    %3 = arith.addi %1, %2 : i32
    %c0_i32 = arith.constant 0 : i32
    %c0_i32_0 = arith.constant 0 : i32
    return %c0_i32, %3 : i32, i32
  }
  func.func @transform_4(%arg0: i32, %arg1: i32) -> (i32, i32) {
    %c1_i32 = arith.constant 1 : i32
    %0 = arith.subi %c1_i32, %arg0 : i32
    %1 = arith.muli %arg1, %0 : i32
    %c3_i32 = arith.constant 3 : i32
    %2 = arith.muli %c3_i32, %arg0 : i32
    %3 = arith.addi %1, %2 : i32
    %c0_i32 = arith.constant 0 : i32
    %c0_i32_0 = arith.constant 0 : i32
    return %c0_i32, %3 : i32, i32
  }
  func.func @transform_5(%arg0: i32, %arg1: i32) -> (i32, i32) {
    %c0_i32 = arith.constant 0 : i32
    %c0_i32_0 = arith.constant 0 : i32
    return %c0_i32, %arg1 : i32, i32
  }
  func.func @transform_6(%arg0: i32, %arg1: i32) -> (i32, i32) {
    %c0_i32 = arith.constant 0 : i32
    %c0_i32_0 = arith.constant 0 : i32
    %c0_i32_1 = arith.constant 0 : i32
    return %c0_i32, %c0_i32_0 : i32, i32
  }
  func.func @transform_7(%arg0: i32, %arg1: i32) -> (i32, i32) {
    %c1_i32 = arith.constant 1 : i32
    %0 = arith.subi %c1_i32, %arg0 : i32
    %1 = arith.muli %arg1, %0 : i32
    %c3_i32 = arith.constant 3 : i32
    %2 = arith.muli %c3_i32, %arg0 : i32
    %3 = arith.addi %1, %2 : i32
    %c0_i32 = arith.constant 0 : i32
    %c0_i32_0 = arith.constant 0 : i32
    return %c0_i32, %3 : i32, i32
  }
  func.func @transform_8(%arg0: i32, %arg1: i32) -> (i32, i32) {
    %c0_i32 = arith.constant 0 : i32
    %c0_i32_0 = arith.constant 0 : i32
    %c0_i32_1 = arith.constant 0 : i32
    return %c0_i32, %c0_i32_0 : i32, i32
  }
  func.func @transform_9(%arg0: i32, %arg1: i32) -> (i32, i32) {
    %c0_i32 = arith.constant 0 : i32
    %c0_i32_0 = arith.constant 0 : i32
    %c0_i32_1 = arith.constant 0 : i32
    return %c0_i32, %c0_i32_0 : i32, i32
  }
}

</mosaic_0001>

<bundles_post_ra>
// kernel: stage1_total_loss.1
= control target key start
LH: loop header
LB: loop body
LE: loop exit
PB: predicated region body
PF: predicated region fallthrough
CT: control target
= control target key end

     0   :  { %s3258_s0 = inlined_call_operand.vmem [shape: f32[3], index: 0, kind: input, shape index: {}]   ;;  %s3259_s1 = inlined_call_operand.vmem [shape: f32[8,512], index: 1, kind: input, shape index: {}]   ;;  %s3260_s2 = inlined_call_operand.vmem [shape: f32[8,512], index: 2, kind: input, shape index: {}]   ;;  %s3261_s3 = inlined_call_operand.vmem [shape: f32[8,512], index: 3, kind: input, shape index: {}]   ;;  %s3262_s4 = inlined_call_operand.vmem [shape: f32[8,512], index: 4, kind: input, shape index: {}]   ;;  %s3263_s5 = inlined_call_operand.vmem [shape: f32[8,512], index: 5, kind: input, shape index: {}]   ;;  %s3264_s6 = inlined_call_operand.vmem [shape: f32[264,128], index: 6, kind: input, shape index: {}]   ;;  %s3265_s7 = inlined_call_operand.hbm [shape: f32[512,512], index: 7, kind: input, shape index: {}]   ;;  %s3266_s8 = inlined_call_operand.vmem [shape: f32[1,128], index: 8, kind: output, shape index: {0}]   ;;  %s3267_s9 = inlined_call_operand.hbm [shape: f32[8,1], index: 9, kind: output, shape index: {1}]  }
   0x1   :  { %3296 = sst [smem:[#allocation44_spill]] %s3258_s0 }
   0x2   :  { %3297 = sst [smem:[#allocation45_spill]] %s3259_s1 }
   0x3   :  { %3298 = sst [smem:[#allocation46_spill]] %s3260_s2 }
   0x4   :  { %3299 = sst [smem:[#allocation47_spill]] %s3261_s3 }
   0x5   :  { %3300 = sst [smem:[#allocation48_spill]] %s3262_s4 }
   0x6   :  { %3301 = sst [smem:[#allocation49_spill]] %s3264_s6 }
   0x7   :  { %3302 = sst [smem:[#allocation50_spill]] %s3265_s7 }
   0x8   :  { %3303 = sst [smem:[#allocation51_spill]] %s3266_s8 }
   0x9   :  { %3304 = sst [smem:[#allocation52_spill]] %s3267_s9 }
   0xa   :  { %15 = vsyncpa [#allocation12], 0 }
   0xb   :  { %16 = vsyncpa [#allocation10], 0 }
   0xc   :  { %18 = vsyncpa [#allocation10 + $0x1], 0 }
   0xd   :  { %19 = vsyncpa [#allocation11], 0  ;;  %s2356_s30 = smov 0   ;;  %s2358_s10 = smov 0  }
   0xe   :  { %s2360_s11 = smov 0   ;;  %s2362_s12 = smov 0  }
   0xf   :  { %s2364_s13 = smov 0   ;;  %s2366_s14 = smov 0  }
  0x10   :  { %s2368_s15 = smov 0   ;;  %s2370_s16 = smov 0  }
  0x11 LB: > { %3305 = sst [smem:[#allocation18_spill]] %s2288_s14  ;;  %s3268_s17 = sadd.s32 4294967295, %s2296_s16   ;;  %s2296_s16 = sphi %s2370_s16, %s25_s16   ;;  %s2292_s15 = sphi %s2368_s15, %s3382_s15   ;;  %s2288_s14 = sphi %s2366_s14, %s3381_s14   ;;  %s2284_s13 = sphi %s2364_s13, %s3377_s13   ;;  %s2280_s12 = sphi %s2362_s12, %s3376_s12   ;;  %s2276_s11 = sphi %s2360_s11, %s3380_s11   ;;  %s2272_s10 = sphi %s2358_s10, %s3379_s10   ;;  %s2268_s30 = sphi %s2356_s30, %s3378_s30  }
  0x12   : > { %3306 = sst [smem:[#allocation19_spill]] %s2292_s15  ;;  %p263_p0 = scmp.ne.s32.totalorder %s2276_s11, %s2272_s10 }
  0x13   : > { %3307 = sst [smem:[#allocation20_spill]] %s2296_s16  ;;  %p264_p1 = scmp.eq.s32.totalorder %s2296_s16, 0 }
  0x14   : > { %p269_p2 = scmp.ne.s32.totalorder %s2272_s10, %s2268_s30  ;;  %p2402_p3 = scmp.eq.s32.totalorder %s3268_s17, 0 }
  0x15   : > { %p265_p4 = por %p264_p1, %p263_p0  ;;  %p1986_p5 = scmp.ge.s32.totalorder %s2296_s16, 1 }
  0x16   : > { %p2409_p6 = por %p2402_p3, %p269_p2  ;;  %p322_p7 = scmp.lt.s32.totalorder %s2296_s16, 9 }
  0x17   : > { %s3310_s0 = sld [smem:[#allocation44_spill]]  ;;  %p2031_p10 = scmp.lt.s32.totalorder %s2296_s16, 8 }
  0x18   : > { %p2417_p8 = pnand %p1986_p5, %p322_p7  ;;  %s2298_s26 = smov [#allocation9]  }
  0x19   : > { %p2426_p12 = pnand %p2031_p10, %p265_p4  ;;  %s34_s27 = sadd.s32 1, %s2288_s14 }
  0x1a   : > { %p2022_p9 = pneg %p2417_p8  ;;  %s37_s28 = sadd.s32 1, %s2292_s15 }
  0x1b   : > { %p35_p13 = scmp.ge.s32.totalorder %s34_s27, 4  ;;  %s245_s29 = ssub.s32 1, %s2292_s15 }
  0x1c   : > { %p2023_p11 = pnand %p2022_p9, %p2402_p3  ;;  %s246_s30 = smul.u32 %s2288_s14, %s245_s29 }
  0x1d   : > { %s334_s23 = sshll.u32 %s3310_s0, 4  ;;  %s415_s21 = sand.u32 1, %s2276_s11   ;;  %s335_s23 = int_to_ptr.vmem [resolvable:$true] %s334_s23 }
  0x1e   : > { %2025 = dma.vmem_to_smem (!%p2023_p11), %s335_s23, 16, %s2298_s26, [#allocation12]  }
  0x1f   : > { %s3384_s27 = smov (%p35_p13, %s34_s27), 0  ;;  %s3386_s28 = smov (!%p35_p13, %s37_s28), %s2292_s15 }
  0x20   : > { %s247_s22 = smul.u32 3, %s2292_s15  ;;  %p39_p0 = scmp.ge.s32.totalorder %s3386_s28, 2 }
  0x21   : > { %s1989_s17 = sshll.u32 %s415_s21, 9  ;;  %s3313_s7 = sld [smem:[#allocation50_spill]] }
  0x22   : > { %s248_s18 = sadd.s32 %s247_s22, %s246_s30  ;;  %s3388_s28 = smov (%p39_p0, %s3386_s28), 0 }
  0x23   : > { %s1990_s23 = sshll.u32 %s248_s18, 3  ;;  %s419_s26 = scalar_lea.vmem [#allocation13], %s1989_s17 }
  0x24   : > { %s430_s0 = sshll.u32 %s419_s26, 4  ;;  %s249_s29 = ssub.s32 1, %s3388_s28  ;;  %s431_s0 = int_to_ptr.vmem [resolvable:$true] %s430_s0 }
  0x25   : > { %s251_s14 = smul.u32 3, %s3388_s28  ;;  %s3314_s22 = sadd.s32 1, %s2276_s11 }
  0x26   : > { %s250_s9 = smul.u32 %s249_s29, %s3384_s27  ;;  %s416_s2 = scalar_lea.sflag [#allocation10], %s415_s21 }
  0x27   : > { %s427_s15 = scalar_lea.hbm %s3313_s7, %s1990_s23  ;;  %s2299_s17 = smov 512  }
  0x28   : > { %s428_s6 = sshll.u32 %s427_s15, 4  ;;  %s252_s4 = sadd.s32 %s251_s14, %s250_s9  ;;  %s429_s6 = int_to_ptr.hbm [resolvable:$true] %s428_s6 }
  0x29   : > { %s253_s30 = ssub.s32 %s248_s18, %s252_s4  ;;  %s2300_s26 = smov 128  }
  0x2a   : > { %p254_p1 = scmp.eq.s32.totalorder %s253_s30, 0  ;;  %s2301_s1 = smov 8  }
  0x2b   : > { %2029 = dma.hbm_to_vmem [thread:$0]  (!%p2426_p12), %s429_s6, 8192, %s431_s0, %s416_s2, %s2299_s17, %s2300_s26, %s2301_s1  }
  0x2c   : > { %s2450_s3 = scalar_select %p254_p1, %s2276_s11, %s3314_s22  }
  0x2d   : > { %442 = sbr.rel (%p2417_p8) target bundleno = 1387 (0x56b), region = 52 }
  0x32   : > { %2255 = dma.done.wait (%p2402_p3), [#allocation12], 16  }
  0x33   : > { %2257 = vsyncadd (%p2402_p3), [#allocation12], 4294967280  ;;  %s449_s4 = sand.u32 1, %s2272_s10  }
  0x34   : > { %s1993_s8 = sshll.u32 %s449_s4, 9  ;;  %s450_s9 = scalar_lea.sflag [#allocation10], %s449_s4 }
  0x35   : > { %s2461_s14 = scalar_lea.vmem [#allocation13], %s1993_s8 }
  0x36   : > { %2259 = dma.done.wait (%p2409_p6), %s450_s9, 8192  }
  0x37   : > { %2261 = vsyncadd (%p2409_p6), %s450_s9, 4294959104 }
  0x38   : > { %459 = sfence }
  0x39   : > { %s521_s0 = ssub.s32 1, %s2284_s13  ;;  %s523_s1 = smul.u32 3, %s2284_s13 }
  0x3a   : > { %s522_s2 = smul.u32 %s2280_s12, %s521_s0  ;;  %p569_p2 = scmp.lt.s32.totalorder %s2280_s12, 3 }
  0x3b   : > { %s2471_s6 = sld [smem:[#allocation9]]  ;;  %p580_p3 = scmp.eq.s32.totalorder %s2284_s13, 0 }
  0x3c   : > { %s524_s15 = sadd.s32 %s523_s1, %s522_s2  ;;  %s2474_s16 = sld [smem:[#allocation9 + $0x1]] }
  0x3d   : > { %p525_p4 = scmp.lt.s32.totalorder %s524_s15, 3  ;;  %s2476_s18 = sld [smem:[#allocation9 + $0x2]] }
  0x3e   : > { %s570_s19 = scalar_select %p569_p2, %s2280_s12, 3 }
  0x3f   : > { %s3390_s15 = smov (!%p525_p4, %s524_s15), 3  ;;  %p581_p5 = scmp.eq.s32.totalorder %s2280_s12, 0 }
  0x40   : > { %s1998_s20 = sshll.u32 %s570_s19, 3  ;;  %s2480_s24 = sshll.u32 %s3390_s15, 3 }
  0x41   : > { %s2485_s23 = scalar_lea.vmem %s3263_s5, %s1998_s20  ;;  %s3315_s22 = sld [smem:[#allocation45_spill]] }
  0x42   : > { %s3316_s8 = sld [smem:[#allocation46_spill]]  ;;  %p582_p6 = pnand %p581_p5, %p580_p3 }
  0x43   : > { %s3317_s2 = sld [smem:[#allocation47_spill]] }
  0x44   : > { %s3318_s21 = sld [smem:[#allocation48_spill]] }
  0x46   : > { %585 = sbr.rel (%p582_p6) target bundleno = 83 (0x53), region = 64 }
  0x47   : > { %s528_s17 = scalar_lea.vmem %s3315_s22, %s2480_s24 }
  0x48   : > { %s540_s9 = scalar_lea.vmem %s3316_s8, %s2480_s24 }
  0x49   : > { %s552_s15 = scalar_lea.vmem %s3317_s2, %s2480_s24 }
  0x4a   : > { %s564_s7 = scalar_lea.vmem %s3318_s21, %s2480_s24 }
  0x4b   : > { %vm586_vm0 = vcmask 7168   ;;  %vm588_vm1 = vcmask 0   ;;  %v2302_v0 = vmov 0.0  }
  0x4c   : > { %587 = vst.msk [vmem:[#allocation2] sm:$0xff] %vm586_vm0, %v2302_v0 }
  0x4d   : > { %589 = vst.msk [vmem:[#allocation3] sm:$0x1] %vm588_vm1, %v2302_v0 }
  0x4e   : > { %590 = vst.msk [vmem:[#allocation4] sm:$0x1] %vm588_vm1, %v2302_v0 }
  0x4f   : > { %591 = vst.msk [vmem:[#allocation5] sm:$0x1] %vm588_vm1, %v2302_v0 }
  0x50   : > { %592 = vst.msk [vmem:[#allocation6] sm:$0x1] %vm588_vm1, %v2302_v0 }
  0x51   : > { %593 = vst.msk [vmem:[#allocation7] sm:$0x1] %vm588_vm1, %v2302_v0 }
  0x52   : > { %594 = vst.msk [vmem:[#allocation8] sm:$0x1] %vm588_vm1, %v2302_v0 }
  0x53 PF: > { %p2001_p7 = scmp.ne.s32.totalorder %s2284_s13, 0 }
  0x55   : > { %597 = sbr.rel (%p2001_p7) target bundleno = 891 (0x37b), region = 68 }
  0x5a   : > { %v753_v1 = vld [vmem:[%s2485_s23] sm:$0xff]  ;;  %v2508_v2 = vld [vmem:[%s2461_s14 + $0x8] sm:$0xff]  ;;  %v2516_v7 = vld [vmem:[%s2461_s14] sm:$0xff]  ;;  %v2522_v9 = vstv %s2471_s6  ;;  %vm759_vm2 = vcmask 7168   ;;  %vm675_vm3 = vcmask 0   ;;  %p2006_p8 = scmp.ne.s32.totalorder %s2280_s12, 0 }
  0x5b   : > { %v2511_v3 = vld [vmem:[%s2461_s14 + $0x18] sm:$0xff]  ;;  %v755_v4 = vmul.f32 %v753_v1, %v753_v1  ;;  %v826_v5 = vand.u32 2147483647, %v2508_v2  ;;  %v2519_v8 = vld [vmem:[%s2461_s14 + $0x10] sm:$0xff]  ;;  %v2528_v11 = vld [vmem:[%s2461_s14 + $0x20] sm:$0xff]  ;;  %v610_v27 = vstv %s2474_s16  ;;  %s3369_s16 = sld [smem:[#allocation49_spill]] (!%p2006_p8) }
  0x5c   : > { %v828_v6 = vand.u32 2147483647, %v2511_v3  ;;  %v2525_v10 = vld [vmem:[%s2461_s14 + $0x30] sm:$0xff]  ;;  %v2531_v12 = vld [vmem:[%s2461_s14 + $0x28] sm:$0xff]  ;;  %v825_v13 = vand.u32 2147483647, %v2516_v7 }
  0x5d   : > { %756 = vadd.xlane.f32.xlu1 %v755_v4  ;;  %891 = vadd.xlane.f32.xlu2 %v826_v5  ;;  %v599_v14 = vld [vmem:[%s528_s17] sm:$0xff]  ;;  %v827_v16 = vand.u32 2147483647, %v2519_v8  ;;  %v831_v20 = vand.u32 2147483647, %v2525_v10  ;;  %v2554_v23 = vld [vmem:[%s2461_s14 + $0x48] sm:$0xff] }
  0x5e   : > { %895 = vadd.xlane.f32.xlu0 %v828_v6  ;;  %v2544_v15 = vld [vmem:[%s552_s15] sm:$0xff]  ;;  %v601_v17 = vmax.f32 %v599_v14, 1e-08  ;;  %v829_v21 = vand.u32 2147483647, %v2528_v11  ;;  %v2578_v34 = vld [vmem:[%s2461_s14 + $0x40] sm:$0xff] }
  0x5f   : > { %v614_v18 = vadd.f32 %v2522_v9, %v2544_v15  ;;  %v640_v19 = vadd.f32 1.0, %v2544_v15  ;;  %v830_v22 = vand.u32 2147483647, %v2531_v12  ;;  %v678_v31 = vld [vmem:[%s540_s9] sm:$0xff]  ;;  %v834_v38 = vand.u32 2147483647, %v2554_v23 }
  0x60   : > { %2107 = vlog2.f32 %v601_v17  ;;  %v605_v24 = vadd.f32 %v2522_v9, %v601_v17  ;;  %v2572_v32 = vld [vmem:[%s564_s7] sm:$0xff]  ;;  %v680_v42 = vmax.f32 %v678_v31, 1e-08  ;;  %v833_v45 = vand.u32 2147483647, %v2578_v34 }
  0x61   : > { %v2557_v25 = vadd.f32 4.0, %v614_v18  ;;  %v630_v26 = vadd.f32 1.0, %v614_v18  ;;  %v632_v28 = vadd.f32 2.0, %v614_v18  ;;  %v2560_v29 = vadd.f32 4.0, %v640_v19  ;;  %v2575_v33 = vld [vmem:[%s2461_s14 + $0x38] sm:$0xff]  ;;  %v2589_v47 = vld [vmem:[%s2461_s14 + $0x50] sm:$0xff]  ;;  %s3370_s24 = smov (!%p2006_p8), %s3369_s16 }
  0x62   : > { %v656_v30 = vadd.f32 1.0, %v640_v19  ;;  %2109 = vlog2.f32 %v605_v24  ;;  %v634_v36 = vadd.f32 3.0, %v614_v18  ;;  %v658_v37 = vadd.f32 2.0, %v640_v19  ;;  %v2602_v4 = vld [vmem:[%s2461_s14 + $0x58] sm:$0xff] }
  0x63   : > { %v631_v35 = vmul.f32 %v630_v26, %v614_v18  ;;  %2111 = vrcp.f32 %v2557_v25  ;;  %v660_v40 = vadd.f32 3.0, %v640_v19  ;;  %v691_v43 = vadd.f32 %v2572_v32, %v2522_v9 }
  0x64   : > { %v657_v39 = vmul.f32 %v656_v30, %v640_v19  ;;  %2113 = vlog2.f32 %v2557_v25  ;;  %v832_v44 = vand.u32 2147483647, %v2575_v33  ;;  %v683_v50 = vadd.f32 %v680_v42, %v2522_v9 }
  0x65   : > { %889 = vadd.xlane.f32.xlu1 %v825_v13  ;;  %893 = vadd.xlane.f32.xlu2 %v827_v16  ;;  %v633_v41 = vmul.f32 %v632_v28, %v631_v35  ;;  %2115 = vrcp.f32 %v2560_v29  ;;  %v2593_v51 = vadd.f32 4.0, %v691_v43  ;;  %v707_v54 = vadd.f32 1.0, %v691_v43 }
  0x66   : > { %901 = vadd.xlane.f32.xlu0 %v831_v20  ;;  %v659_v46 = vmul.f32 %v658_v37, %v657_v39  ;;  %v2108_v48 = vpop.eup %2107  ;;  %2117 = vlog2.f32 %v2560_v29  ;;  %v2002_v56 = vadd.f32 -0.5, %v2557_v25  ;;  %v835_v57 = vand.u32 2147483647, %v2589_v47 }
  0x67   : > { %v635_v49 = vmul.f32 %v634_v36, %v633_v41  ;;  %v603_v52 = vmul.f32 0.6931472, %v2108_v48  ;;  %2119 = vlog2.f32 %v680_v42  ;;  %v709_v58 = vadd.f32 2.0, %v691_v43 }
  0x68   : > { %v661_v53 = vmul.f32 %v660_v40, %v659_v46  ;;  %v2110_v55 = vpop.eup %2109  ;;  %v708_v61 = vmul.f32 %v707_v54, %v691_v43  ;;  %v2598_v62 = vadd.f32 1.0, %v2572_v32  ;;  %v2003_v1 = vadd.f32 -0.5, %v2560_v29 }
  0x69   : > { %2121 = vlog2.f32 %v635_v49  ;;  %v2112_v59 = vpop.eup %2111  ;;  %v607_v60 = vmul.f32 0.6931472, %v2110_v55  ;;  %v711_v5 = vadd.f32 3.0, %v691_v43  ;;  %v836_v30 = vand.u32 2147483647, %v2602_v4 }
  0x6a   : > { %2123 = vlog2.f32 %v661_v53  ;;  %v2114_v63 = vpop.eup %2113  ;;  %v617_v0 = vmul.f32 %v2112_v59, %v2112_v59  ;;  %v710_v20 = vmul.f32 %v709_v58, %v708_v61  ;;  %v2004_v36 = vadd.f32 -0.5, %v2593_v51 }
  0x6b   : > { %2125 = vlog2.f32 %v683_v50  ;;  %v2116_v6 = vpop.eup %2115  ;;  %v608_v13 = vsub.f32 %v603_v52, %v607_v60  ;;  %v611_v14 = vsub.f32 %v610_v27, %v607_v60  ;;  %v625_v16 = vmul.f32 0.6931472, %v2114_v63 }
  0x6c   : > { %2127 = vrcp.f32 %v2593_v51  ;;  %v2118_v17 = vpop.eup %2117  ;;  %v618_v18 = vmul.f32 0.0007936508, %v617_v0  ;;  %v643_v19 = vmul.f32 %v2116_v6, %v2116_v6  ;;  %v733_v37 = vadd.f32 1.0, %v2598_v62 }
  0x6d   : > { %897 = vadd.xlane.f32.xlu1 %v829_v21  ;;  %899 = vadd.xlane.f32.xlu2 %v830_v22  ;;  %2129 = vlog2.f32 %v2593_v51  ;;  %v2120_v24 = vpop.eup %2119  ;;  %v626_v26 = vmul.f32 %v2002_v56, %v625_v16  ;;  %v651_v28 = vmul.f32 0.6931472, %v2118_v17  ;;  %v2610_v21 = vadd.f32 4.0, %v2598_v62 }
  0x6e   : > { %907 = vadd.xlane.f32.xlu0 %v834_v38  ;;  %v619_v31 = vsub.f32 0.0027777778, %v618_v18  ;;  %v644_v35 = vmul.f32 0.0007936508, %v643_v19  ;;  %v712_v41 = vmul.f32 %v711_v5, %v710_v20  ;;  %v735_v42 = vadd.f32 2.0, %v2598_v62 }
  0x6f   : > { %v2122_v22 = vpop.eup %2121  ;;  %v627_v39 = vsub.f32 %v626_v26, %v2557_v25  ;;  %v652_v40 = vmul.f32 %v2003_v1, %v651_v28  ;;  %v609_v46 = vmul.f32 %v608_v13, %v2522_v9  ;;  %v612_v48 = vmul.f32 %v611_v14, %v2544_v15 }
  0x70   : > { %v2124_v38 = vpop.eup %2123  ;;  %v620_v49 = vmul.f32 %v619_v31, %v617_v0  ;;  %v645_v50 = vsub.f32 0.0027777778, %v644_v35  ;;  %v637_v53 = vmul.f32 0.6931472, %v2122_v22  ;;  %v682_v55 = vmul.f32 0.6931472, %v2120_v24 }
  0x71   : > { %v2126_v43 = vpop.eup %2125  ;;  %v653_v54 = vsub.f32 %v652_v40, %v2560_v29  ;;  %2131 = vrcp.f32 %v2610_v21  ;;  %v628_v58 = vadd.f32 0.9189385, %v627_v39  ;;  %v613_v13 = vadd.f32 %v612_v48, %v609_v46 }
  0x72   : > { %v2128_v52 = vpop.eup %2127  ;;  %v621_v25 = vsub.f32 0.083333336, %v620_v49  ;;  %v646_v60 = vmul.f32 %v645_v50, %v643_v19  ;;  %v685_v63 = vmul.f32 0.6931472, %v2126_v43  ;;  %2133 = vlog2.f32 %v712_v41 }
  0x73   : > { %v2130_v56 = vpop.eup %2129  ;;  %v694_v61 = vmul.f32 %v2128_v52, %v2128_v52  ;;  %v654_v15 = vadd.f32 0.9189385, %v653_v54  ;;  %2135 = vlog2.f32 %v2610_v21  ;;  %v663_v14 = vmul.f32 0.6931472, %v2124_v38  ;;  %v2638_v54 = vld [vmem:[%s2461_s14 + $0x70] sm:$0xff] }
  0x74   : > { %v702_v0 = vmul.f32 0.6931472, %v2130_v56  ;;  %v622_v29 = vmul.f32 %v2112_v59, %v621_v25  ;;  %v647_v1 = vsub.f32 0.083333336, %v646_v60  ;;  %v734_v17 = vmul.f32 %v733_v37, %v2598_v62 }
  0x75   : > { %903 = vadd.xlane.f32.xlu1 %v832_v44  ;;  %905 = vadd.xlane.f32.xlu2 %v833_v45  ;;  %v695_v5 = vmul.f32 0.0007936508, %v694_v61  ;;  %v737_v45 = vadd.f32 3.0, %v2598_v62  ;;  %v686_v24 = vsub.f32 %v682_v55, %v685_v63  ;;  %v688_v26 = vsub.f32 %v610_v27, %v685_v63  ;;  %v2641_v55 = vld [vmem:[%s2461_s14 + $0x68] sm:$0xff] }
  0x76   : > { %v703_v16 = vmul.f32 %v2004_v36, %v702_v0  ;;  %v629_v18 = vadd.f32 %v628_v58, %v622_v29  ;;  %v648_v44 = vmul.f32 %v2116_v6, %v647_v1  ;;  %v736_v28 = vmul.f32 %v735_v42, %v734_v17 }
  0x77   : > { %v696_v19 = vsub.f32 0.0027777778, %v695_v5  ;;  %v2132_v20 = vpop.eup %2131  ;;  %v2005_v37 = vadd.f32 -0.5, %v2610_v21  ;;  %v687_v27 = vmul.f32 %v686_v24, %v2522_v9  ;;  %v2647_v5 = vld [vmem:[%s2461_s14 + $0x88] sm:$0xff] }
  0x78   : > { %v704_v59 = vsub.f32 %v703_v16, %v2593_v51  ;;  %v638_v22 = vsub.f32 %v629_v18, %v637_v53  ;;  %v655_v31 = vadd.f32 %v654_v15, %v648_v44  ;;  %v720_v39 = vmul.f32 %v2132_v20, %v2132_v20  ;;  %v2134_v38 = vpop.eup %2133  ;;  %v2655_v18 = vld [vmem:[%s2461_s14 + $0x60] sm:$0xff] }
  0x79   : > { %v697_v35 = vmul.f32 %v696_v19, %v694_v61  ;;  %v738_v40 = vmul.f32 %v737_v45, %v736_v28  ;;  %v2136_v6 = vpop.eup %2135  ;;  %v689_v51 = vmul.f32 %v688_v26, %v2572_v32  ;;  %v714_v50 = vmul.f32 0.6931472, %v2134_v38  ;;  %v2658_v44 = vld [vmem:[%s2461_s14 + $0xa0] sm:$0xff]  ;;  %v2661_v19 = vld [vmem:[%s2461_s14 + $0x98] sm:$0xff]  ;;  %v2673_v28 = vld [vmem:[%s2461_s14 + $0xb0] sm:$0xff] }
  0x7a   : > { %v705_v36 = vadd.f32 0.9189385, %v704_v59  ;;  %v639_v62 = vadd.f32 %v638_v22, %v613_v13  ;;  %v664_v41 = vsub.f32 %v655_v31, %v663_v14  ;;  %v721_v46 = vmul.f32 0.0007936508, %v720_v39  ;;  %v2667_v26 = vld [vmem:[%s2461_s14 + $0x78] sm:$0xff]  ;;  %v2682_v38 = vld [vmem:[%s2461_s14 + $0xd0] sm:$0xff] }
  0x7b   : > { %v698_v43 = vsub.f32 0.083333336, %v697_v35  ;;  %v728_v42 = vmul.f32 0.6931472, %v2136_v6  ;;  %2137 = vlog2.f32 %v738_v40  ;;  %v839_v32 = vand.u32 2147483647, %v2638_v54 }
  0x7c   : > { %v665_v48 = vsub.f32 %v639_v62, %v664_v41  ;;  %v722_v53 = vsub.f32 0.0027777778, %v721_v46  ;;  %v690_v58 = vadd.f32 %v689_v51, %v687_v27  ;;  %v842_v14 = vand.u32 2147483647, %v2647_v5  ;;  %v2670_v59 = vld [vmem:[%s2461_s14 + $0xb8] sm:$0xff]  ;;  %v2691_v62 = vld [vmem:[%s2461_s14 + $0xa8] sm:$0xff] }
  0x7d   : > { %909 = vadd.xlane.f32.xlu1 %v835_v57  ;;  %911 = vadd.xlane.f32.xlu2 %v836_v30  ;;  %v699_v49 = vmul.f32 %v2128_v52, %v698_v43  ;;  %v729_v56 = vmul.f32 %v2005_v37, %v728_v42  ;;  %v838_v30 = vand.u32 2147483647, %v2641_v55  ;;  %v837_v45 = vand.u32 2147483647, %v2655_v18  ;;  %v2694_v41 = vld [vmem:[%s2461_s14 + $0xe8] sm:$0xff]  ;;  %v2697_v43 = vld [vmem:[%s2461_s14 + $0xe0] sm:$0xff] }
  0x7e   : > { %666 = vadd.xlane.f32.xlu0 %v665_v48  ;;  %v723_v25 = vmul.f32 %v722_v53, %v720_v39  ;;  %v844_v24 = vand.u32 2147483647, %v2661_v19  ;;  %v840_v22 = vand.u32 2147483647, %v2667_v26  ;;  %v848_v31 = vand.u32 2147483647, %v2670_v59 }
  0x7f   : > { %v706_v57 = vadd.f32 %v705_v36, %v699_v49  ;;  %v730_v9 = vsub.f32 %v729_v56, %v2610_v21  ;;  %v2650_v21 = vld [vmem:[%s2461_s14 + $0x80] sm:$0xff]  ;;  %v847_v35 = vand.u32 2147483647, %v2673_v28  ;;  %v2679_v39 = vld [vmem:[%s2461_s14 + $0x90] sm:$0xff]  ;;  %v2685_v36 = vld [vmem:[%s2461_s14 + $0xc8] sm:$0xff] }
  0x80   : > { %v724_v60 = vsub.f32 0.083333336, %v723_v25  ;;  %v841_v16 = vand.u32 2147483647, %v2650_v21  ;;  %v843_v37 = vand.u32 2147483647, %v2679_v39 }
  0x81   : > { %v715_v52 = vsub.f32 %v706_v57, %v714_v50  ;;  %v2138_v61 = vpop.eup %2137  ;;  %v731_v15 = vadd.f32 0.9189385, %v730_v9  ;;  %v851_v40 = vand.u32 2147483647, %v2682_v38  ;;  %v850_v6 = vand.u32 2147483647, %v2685_v36 }
  0x82   : > { %v725_v63 = vmul.f32 %v2132_v20, %v724_v60  ;;  %v740_v0 = vmul.f32 0.6931472, %v2138_v61  ;;  %v845_v20 = vand.u32 2147483647, %v2658_v44  ;;  %v846_v46 = vand.u32 2147483647, %v2691_v62 }
  0x83   : > { %v716_v29 = vadd.f32 %v715_v52, %v690_v58  ;;  %v854_v27 = vand.u32 2147483647, %v2694_v41  ;;  %v853_v51 = vand.u32 2147483647, %v2697_v43  ;;  %v2703_v42 = vld [vmem:[%s2461_s14 + $0xc0] sm:$0xff]  ;;  %v2709_v49 = vld [vmem:[%s2461_s14 + $0xf8] sm:$0xff] }
  0x84   : > { %v732_v1 = vadd.f32 %v731_v15, %v725_v63  ;;  %v2706_v48 = vld [vmem:[%s2461_s14 + $0x100] sm:$0xff]  ;;  %v849_v50 = vand.u32 2147483647, %v2703_v42  ;;  %v856_v56 = vand.u32 2147483647, %v2709_v49  ;;  %v2715_v57 = vld [vmem:[%s2461_s14 + $0xd8] sm:$0xff] }
  0x85   : > { %917 = vadd.xlane.f32.xlu2 %v839_v32  ;;  %915 = vadd.xlane.f32.xlu1 %v838_v30  ;;  %v857_v53 = vand.u32 2147483647, %v2706_v48  ;;  %v2718_v25 = vld [vmem:[%s2461_s14 + $0x118] sm:$0xff]  ;;  %v2721_v9 = vld [vmem:[%s2461_s14 + $0x110] sm:$0xff]  ;;  %v852_v32 = vand.u32 2147483647, %v2715_v57 }
  0x86   : > { %v741_v13 = vsub.f32 %v732_v1, %v740_v0  ;;  %3323 = vst [vmem:[#allocation21_spill] sm:$0xff] %v2718_v25  ;;  %v860_v30 = vand.u32 2147483647, %v2718_v25  ;;  %v859_v58 = vand.u32 2147483647, %v2721_v9  ;;  %v2727_v52 = vld [vmem:[%s2461_s14 + $0xf0] sm:$0xff] }
  0x87   : > { %v2730_v60 = vld [vmem:[%s2461_s14 + $0x130] sm:$0xff]  ;;  %v2733_v61 = vld [vmem:[%s2461_s14 + $0x128] sm:$0xff]  ;;  %v855_v15 = vand.u32 2147483647, %v2727_v52 }
  0x88   : > { %v742_v17 = vsub.f32 %v716_v29, %v741_v13  ;;  %3324 = vst [vmem:[#allocation22_spill] sm:$0xff] %v2730_v60  ;;  %v863_v63 = vand.u32 2147483647, %v2730_v60  ;;  %v862_v0 = vand.u32 2147483647, %v2733_v61  ;;  %v2739_v29 = vld [vmem:[%s2461_s14 + $0x108] sm:$0xff] }
  0x89   : > { %v2742_v1 = vld [vmem:[%s2461_s14 + $0x148] sm:$0xff]  ;;  %v2745_v13 = vld [vmem:[%s2461_s14 + $0x140] sm:$0xff] }
  0x8a   : > { %743 = vadd.xlane.f32.xlu0 %v742_v17  ;;  %3325 = vst [vmem:[#allocation23_spill] sm:$0xff] %v2742_v1  ;;  %v865_v17 = vand.u32 2147483647, %v2745_v13 }
  0x8b   : > { %3326 = vst [vmem:[#allocation24_spill] sm:$0xff] %v2745_v13  ;;  %v677_v13 = vld [vmem:[#allocation4] sm:$0x1] }
  0x8d   : > { %923 = vadd.xlane.f32.xlu2 %v842_v14  ;;  %921 = vadd.xlane.f32.xlu1 %v841_v16  ;;  %v858_v14 = vand.u32 2147483647, %v2739_v29  ;;  %v866_v16 = vand.u32 2147483647, %v2742_v1 }
  0x92   : > { %913 = vadd.xlane.f32.xlu0 %v837_v45  ;;  %v2751_v45 = vld [vmem:[%s2461_s14 + $0x120] sm:$0xff] }
  0x95   : > { %929 = vadd.xlane.f32.xlu2 %v845_v20  ;;  %927 = vadd.xlane.f32.xlu1 %v844_v24  ;;  %v754_v20 = vld [vmem:[#allocation2] sm:$0xff]  ;;  %v2754_v24 = vld [vmem:[%s2461_s14 + $0x160] sm:$0xff] }
  0x96   : > { %3327 = vst [vmem:[#allocation25_spill] sm:$0xff] %v2754_v24 }
  0x9a   : > { %919 = vadd.xlane.f32.xlu0 %v840_v22  ;;  %v2757_v22 = vld [vmem:[%s2461_s14 + $0x158] sm:$0xff] }
  0x9b   : > { %3328 = vst [vmem:[#allocation26_spill] sm:$0xff] %v2757_v22 }
  0x9d   : > { %935 = vadd.xlane.f32.xlu2 %v848_v31  ;;  %933 = vadd.xlane.f32.xlu1 %v847_v35  ;;  %v861_v31 = vand.u32 2147483647, %v2751_v45 }
  0xa2   : > { %925 = vadd.xlane.f32.xlu0 %v843_v37 }
  0xa5   : > { %941 = vadd.xlane.f32.xlu2 %v851_v40  ;;  %939 = vadd.xlane.f32.xlu1 %v850_v6  ;;  %v869_v6 = vand.u32 2147483647, %v2754_v24 }
  0xaa   : > { %931 = vadd.xlane.f32.xlu0 %v846_v46  ;;  %v868_v46 = vand.u32 2147483647, %v2757_v22  ;;  %v2829_v22 = vld [vmem:[%s2461_s14 + $0x1e8] sm:$0xff] }
  0xab   : > { %3345 = vst [vmem:[#allocation43_spill] sm:$0xff] %v2829_v22 }
  0xad   : > { %947 = vadd.xlane.f32.xlu2 %v854_v27  ;;  %945 = vadd.xlane.f32.xlu1 %v853_v51  ;;  %v2763_v27 = vld [vmem:[%s2461_s14 + $0x138] sm:$0xff] }
  0xb2   : > { %937 = vadd.xlane.f32.xlu0 %v849_v50  ;;  %v2766_v50 = vld [vmem:[%s2461_s14 + $0x178] sm:$0xff] }
  0xb3   : > { %3329 = vst [vmem:[#allocation27_spill] sm:$0xff] %v2766_v50 }
  0xb5   : > { %953 = vadd.xlane.f32.xlu2 %v857_v53  ;;  %951 = vadd.xlane.f32.xlu1 %v856_v56  ;;  %v2769_v53 = vld [vmem:[%s2461_s14 + $0x170] sm:$0xff]  ;;  %v864_v56 = vand.u32 2147483647, %v2763_v27 }
  0xb6   : > { %3330 = vst [vmem:[#allocation28_spill] sm:$0xff] %v2769_v53 }
  0xba   : > { %943 = vadd.xlane.f32.xlu0 %v852_v32 }
  0xbd   : > { %959 = vadd.xlane.f32.xlu2 %v860_v30  ;;  %957 = vadd.xlane.f32.xlu1 %v859_v58  ;;  %v872_v58 = vand.u32 2147483647, %v2766_v50 }
  0xc2   : > { %949 = vadd.xlane.f32.xlu0 %v855_v15  ;;  %v871_v15 = vand.u32 2147483647, %v2769_v53 }
  0xc5   : > { %965 = vadd.xlane.f32.xlu2 %v863_v63  ;;  %963 = vadd.xlane.f32.xlu1 %v862_v0  ;;  %v2775_v63 = vld [vmem:[%s2461_s14 + $0x150] sm:$0xff] }
  0xc6   : > { %3331 = vst [vmem:[#allocation29_spill] sm:$0xff] %v2775_v63  ;;  %v2778_v0 = vld [vmem:[%s2461_s14 + $0x190] sm:$0xff] }
  0xc7   : > { %3332 = vst [vmem:[#allocation30_spill] sm:$0xff] %v2778_v0 }
  0xca   : > { %955 = vadd.xlane.f32.xlu0 %v858_v14  ;;  %v2781_v14 = vld [vmem:[%s2461_s14 + $0x188] sm:$0xff] }
  0xcb   : > { %3333 = vst [vmem:[#allocation31_spill] sm:$0xff] %v2781_v14 }
  0xcd   : > { %971 = vadd.xlane.f32.xlu2 %v866_v16  ;;  %969 = vadd.xlane.f32.xlu1 %v865_v17  ;;  %v867_v17 = vand.u32 2147483647, %v2775_v63 }
  0xd0   : > { %v757_v35 = vpop.xlane.xlu1 %756  ;;  %v892_v37 = vpop.xlane.xlu2 %891 }
  0xd1   : > { %v758_v40 = vadd.f32 %v757_v35, %v754_v20  ;;  %v896_v51 = vpop.xlane.xlu0 %895  ;;  %v875_v35 = vand.u32 2147483647, %v2778_v0 }
  0xd2   : > { %961 = vadd.xlane.f32.xlu0 %v861_v31 }
  0xd3   : > { %760 = vst.msk [vmem:[#allocation2] sm:$0xff] %vm759_vm2, %v758_v40  ;;  %v874_v40 = vand.u32 2147483647, %v2781_v14  ;;  %v2802_v14 = vld [vmem:[%s2461_s14 + $0x1c0] sm:$0xff] }
  0xd4   : > { %3338 = vst [vmem:[#allocation36_spill] sm:$0xff] %v2802_v14 }
  0xd5   : > { %977 = vadd.xlane.f32.xlu2 %v869_v6  ;;  %975 = vadd.xlane.f32.xlu1 %v868_v46  ;;  %v2787_v46 = vld [vmem:[%s2461_s14 + $0x168] sm:$0xff] }
  0xd6   : > { %3334 = vst [vmem:[#allocation32_spill] sm:$0xff] %v2787_v46  ;;  %v870_v50 = vand.u32 2147483647, %v2787_v46  ;;  %v2814_v46 = vld [vmem:[%s2461_s14 + $0x1d8] sm:$0xff] }
  0xd7   : > { %3341 = vst [vmem:[#allocation39_spill] sm:$0xff] %v2814_v46 }
  0xd8   : > { %v890_v32 = vpop.xlane.xlu1 %889  ;;  %v894_v30 = vpop.xlane.xlu2 %893 }
  0xd9   : > { %v902_v16 = vpop.xlane.xlu0 %901  ;;  %v1017_v6 = vadd.f32 %v892_v37, %v890_v32 }
  0xda   : > { %967 = vadd.xlane.f32.xlu0 %v864_v56  ;;  %v2790_v56 = vld [vmem:[%s2461_s14 + $0x1a8] sm:$0xff] }
  0xdb   : > { %3335 = vst [vmem:[#allocation33_spill] sm:$0xff] %v2790_v56  ;;  %v878_v37 = vand.u32 2147483647, %v2790_v56 }
  0xdd   : > { %983 = vadd.xlane.f32.xlu2 %v872_v58  ;;  %981 = vadd.xlane.f32.xlu1 %v871_v15  ;;  %v2793_v58 = vld [vmem:[%s2461_s14 + $0x1a0] sm:$0xff]  ;;  %v1018_v15 = vadd.f32 %v1017_v6, %v894_v30  ;;  %v2805_v30 = vld [vmem:[%s2461_s14 + $0x1b8] sm:$0xff] }
  0xde   : > { %3336 = vst [vmem:[#allocation34_spill] sm:$0xff] %v2793_v58  ;;  %v877_v32 = vand.u32 2147483647, %v2793_v58  ;;  %v881_v58 = vand.u32 2147483647, %v2802_v14 }
  0xdf   : > { %3339 = vst [vmem:[#allocation37_spill] sm:$0xff] %v2805_v30 }
  0xe0   : > { %v898_v20 = vpop.xlane.xlu1 %897  ;;  %v900_v31 = vpop.xlane.xlu2 %899 }
  0xe1   : > { %v908_v1 = vpop.xlane.xlu0 %907 }
  0xe2   : > { %973 = vadd.xlane.f32.xlu0 %v867_v17  ;;  %v1019_v17 = vadd.f32 %v1018_v15, %v896_v51  ;;  %v880_v51 = vand.u32 2147483647, %v2805_v30  ;;  %v884_v30 = vand.u32 2147483647, %v2814_v46 }
  0xe5   : > { %989 = vadd.xlane.f32.xlu2 %v875_v35  ;;  %987 = vadd.xlane.f32.xlu1 %v874_v40  ;;  %v2799_v35 = vld [vmem:[%s2461_s14 + $0x180] sm:$0xff]  ;;  %v1020_v40 = vadd.f32 %v1019_v17, %v898_v20 }
  0xe6   : > { %3337 = vst [vmem:[#allocation35_spill] sm:$0xff] %v2799_v35  ;;  %v873_v6 = vand.u32 2147483647, %v2799_v35  ;;  %v2817_v35 = vld [vmem:[%s2461_s14 + $0x1d0] sm:$0xff] }
  0xe7   : > { %3342 = vst [vmem:[#allocation40_spill] sm:$0xff] %v2817_v35 }
  0xe8   : > { %v904_v24 = vpop.xlane.xlu1 %903  ;;  %v906_v0 = vpop.xlane.xlu2 %905 }
  0xea   : > { %979 = vadd.xlane.f32.xlu0 %v870_v50  ;;  %v1021_v50 = vadd.f32 %v1020_v40, %v900_v31 }
  0xec   : > { %v1022_v20 = vadd.f32 %v1021_v50, %v902_v16 }
  0xed   : > { %995 = vadd.xlane.f32.xlu2 %v878_v37  ;;  %993 = vadd.xlane.f32.xlu1 %v877_v32  ;;  %v2811_v32 = vld [vmem:[%s2461_s14 + $0x198] sm:$0xff] }
  0xee   : > { %3340 = vst [vmem:[#allocation38_spill] sm:$0xff] %v2811_v32  ;;  %v1023_v60 = vadd.f32 %v1022_v20, %v904_v24  ;;  %v876_v31 = vand.u32 2147483647, %v2811_v32  ;;  %v2826_v20 = vld [vmem:[%s2461_s14 + $0x1f0] sm:$0xff] }
  0xef   : > { %3344 = vst [vmem:[#allocation42_spill] sm:$0xff] %v2826_v20 }
  0xf0   : > { %v910_v53 = vpop.xlane.xlu1 %909  ;;  %v912_v56 = vpop.xlane.xlu2 %911  ;;  %v1024_v16 = vadd.f32 %v1023_v60, %v906_v0 }
  0xf1   : > { %v667_v15 = vpop.xlane.xlu0 %666 }
  0xf2   : > { %985 = vadd.xlane.f32.xlu0 %v873_v6  ;;  %v668_v37 = vrot.slane %v667_v15, 4  ;;  %v1025_v46 = vadd.f32 %v1024_v16, %v908_v1 }
  0xf4   : > { %v669_v17 = vadd.f32 %v668_v37, %v667_v15  ;;  %v598_v15 = vld [vmem:[#allocation3] sm:$0x1]  ;;  %v2823_v37 = vld [vmem:[%s2461_s14 + $0x1b0] sm:$0xff] }
  0xf5   : > { %1001 = vadd.xlane.f32.xlu2 %v881_v58  ;;  %999 = vadd.xlane.f32.xlu1 %v880_v51  ;;  %v883_v58 = vand.u32 2147483647, %v2817_v35  ;;  %3343 = vst [vmem:[#allocation41_spill] sm:$0xff] %v2823_v37  ;;  %v879_v60 = vand.u32 2147483647, %v2823_v37 }
  0xf6   : > { %v670_v14 = vrot.slane %v669_v17, 2 }
  0xf8   : > { %v918_v40 = vpop.xlane.xlu2 %917  ;;  %v916_v6 = vpop.xlane.xlu1 %915  ;;  %v671_v51 = vadd.f32 %v670_v14, %v669_v17  ;;  %v887_v17 = vand.u32 2147483647, %v2826_v20 }
  0xfa   : > { %v672_v50 = vrot.slane %v671_v51, 1  ;;  %991 = vadd.xlane.f32.xlu0 %v876_v31  ;;  %v1026_v31 = vadd.f32 %v1025_v46, %v910_v53  ;;  %v1094_v53 = vmul.f32 %v2508_v2, %v2508_v2 }
  0xfc   : > { %v673_v24 = vadd.f32 %v672_v50, %v671_v51  ;;  %v2836_v50 = vld [vmem:[%s2461_s14 + $0x1c8] sm:$0xff]  ;;  %v1027_v1 = vadd.f32 %v1026_v31, %v912_v56  ;;  %v2844_v56 = vld [vmem:[%s2461_s14 + $0x1e0] sm:$0xff] }
  0xfd   : > { %1007 = vadd.xlane.f32.xlu2 %v884_v30  ;;  %1005 = vadd.xlane.f32.xlu1 %v883_v58  ;;  %v744_v32 = vpop.xlane.xlu0 %743  ;;  %v886_v30 = vand.u32 2147483647, %v2829_v22  ;;  %v882_v20 = vand.u32 2147483647, %v2836_v50  ;;  %v885_v31 = vand.u32 2147483647, %v2844_v56 }
  0xfe   : > { %v674_v63 = vadd.f32 %v673_v24, %v598_v15  ;;  %v745_v35 = vrot.slane %v744_v32, 4 }
 0x100   : > { %v924_v0 = vpop.xlane.xlu2 %923  ;;  %v922_v14 = vpop.xlane.xlu1 %921  ;;  %676 = vst.msk [vmem:[#allocation3] sm:$0x1] %vm675_vm3, %v674_v63  ;;  %v746_v58 = vadd.f32 %v745_v35, %v744_v32  ;;  %v1093_v63 = vmul.f32 %v2516_v7, %v2516_v7  ;;  %v1096_v7 = vmul.f32 %v2511_v3, %v2511_v3  ;;  %v1100_v3 = vmul.f32 %v2575_v33, %v2575_v33 }
 0x102   : > { %v747_v51 = vrot.slane %v746_v58, 2  ;;  %997 = vadd.xlane.f32.xlu0 %v879_v60 }
 0x104   : > { %v748_v16 = vadd.f32 %v747_v51, %v746_v58 }
 0x105   : > { %1013 = vadd.xlane.f32.xlu2 %v887_v17  ;;  %1011 = vadd.xlane.f32.xlu1 %v886_v30  ;;  %v914_v15 = vpop.xlane.xlu0 %913 }
 0x106   : > { %v749_v24 = vrot.slane %v748_v16, 1  ;;  %v1028_v37 = vadd.f32 %v1027_v1, %v914_v15 }
 0x108   : > { %v930_v25 = vpop.xlane.xlu2 %929  ;;  %v928_v22 = vpop.xlane.xlu1 %927  ;;  %v750_v46 = vadd.f32 %v749_v24, %v748_v16  ;;  %v1029_v35 = vadd.f32 %v1028_v37, %v916_v6  ;;  %v2853_v37 = vld [vmem:[%s2461_s14 + $0x1f8] sm:$0xff]  ;;  %v1099_v24 = vmul.f32 %v2525_v10, %v2525_v10  ;;  %v1103_v10 = vmul.f32 %v2589_v47, %v2589_v47 }
 0x109   : > { %v888_v1 = vand.u32 2147483647, %v2853_v37 }
 0x10a   : > { %v751_v32 = vadd.f32 %v750_v46, %v677_v13  ;;  %1003 = vadd.xlane.f32.xlu0 %v882_v20  ;;  %v1030_v60 = vadd.f32 %v1029_v35, %v918_v40  ;;  %v1097_v13 = vmul.f32 %v2528_v11, %v2528_v11 }
 0x10c   : > { %752 = vst.msk [vmem:[#allocation4] sm:$0x1] %vm675_vm3, %v751_v32  ;;  %v1102_v32 = vmul.f32 %v2554_v23, %v2554_v23  ;;  %v1106_v23 = vmul.f32 %v2641_v55, %v2641_v55 }
 0x10d   : > { %1159 = vadd.xlane.f32.xlu2 %v1094_v53  ;;  %1157 = vadd.xlane.f32.xlu1 %v1093_v63  ;;  %v920_v17 = vpop.xlane.xlu0 %919 }
 0x10e   : > { %v1031_v30 = vadd.f32 %v1030_v60, %v920_v17  ;;  %v1098_v17 = vmul.f32 %v2531_v12, %v2531_v12 }
 0x110   : > { %v936_v2 = vpop.xlane.xlu2 %935  ;;  %v934_v58 = vpop.xlane.xlu1 %933  ;;  %v1032_v6 = vadd.f32 %v1031_v30, %v922_v14 }
 0x112   : > { %1009 = vadd.xlane.f32.xlu0 %v885_v31  ;;  %v1033_v20 = vadd.f32 %v1032_v6, %v924_v0  ;;  %v1095_v0 = vmul.f32 %v2519_v8, %v2519_v8  ;;  %v1105_v31 = vmul.f32 %v2655_v18, %v2655_v18  ;;  %v1109_v18 = vmul.f32 %v2650_v21, %v2650_v21 }
 0x115   : > { %1163 = vadd.xlane.f32.xlu1 %v1096_v7  ;;  %1165 = vadd.xlane.f32.xlu2 %v1097_v13  ;;  %v926_v40 = vpop.xlane.xlu0 %925  ;;  %v1101_v13 = vmul.f32 %v2578_v34, %v2578_v34 }
 0x116   : > { %v1034_v51 = vadd.f32 %v1033_v20, %v926_v40  ;;  %v1108_v20 = vmul.f32 %v2667_v26, %v2667_v26  ;;  %v1112_v26 = vmul.f32 %v2661_v19, %v2661_v19 }
 0x118   : > { %v942_v16 = vpop.xlane.xlu2 %941  ;;  %v940_v15 = vpop.xlane.xlu1 %939  ;;  %v1035_v11 = vadd.f32 %v1034_v51, %v928_v22 }
 0x11a   : > { %1015 = vadd.xlane.f32.xlu0 %v888_v1  ;;  %v1036_v14 = vadd.f32 %v1035_v11, %v930_v25 }
 0x11d   : > { %1169 = vadd.xlane.f32.xlu1 %v1099_v24  ;;  %1171 = vadd.xlane.f32.xlu2 %v1100_v3  ;;  %v932_v53 = vpop.xlane.xlu0 %931  ;;  %v1111_v24 = vmul.f32 %v2679_v39, %v2679_v39  ;;  %v1115_v39 = vmul.f32 %v2673_v28, %v2673_v28 }
 0x11e   : > { %v1037_v63 = vadd.f32 %v1036_v14, %v932_v53  ;;  %v1107_v53 = vmul.f32 %v2638_v54, %v2638_v54 }
 0x120   : > { %v948_v46 = vpop.xlane.xlu2 %947  ;;  %v946_v35 = vpop.xlane.xlu1 %945  ;;  %v1038_v60 = vadd.f32 %v1037_v63, %v934_v58 }
 0x122   : > { %1161 = vadd.xlane.f32.xlu0 %v1095_v0  ;;  %v1039_v33 = vadd.f32 %v1038_v60, %v936_v2  ;;  %v1114_v0 = vmul.f32 %v2691_v62, %v2691_v62  ;;  %v1118_v62 = vmul.f32 %v2685_v36, %v2685_v36 }
 0x125   : > { %1175 = vadd.xlane.f32.xlu1 %v1102_v32  ;;  %1177 = vadd.xlane.f32.xlu2 %v1103_v10  ;;  %v938_v22 = vpop.xlane.xlu0 %937  ;;  %v1110_v10 = vmul.f32 %v2647_v5, %v2647_v5 }
 0x126   : > { %v1040_v25 = vadd.f32 %v1039_v33, %v938_v22  ;;  %v1117_v33 = vmul.f32 %v2703_v42, %v2703_v42  ;;  %v1121_v42 = vmul.f32 %v2697_v43, %v2697_v43 }
 0x128   : > { %v954_v30 = vpop.xlane.xlu2 %953  ;;  %v952_v8 = vpop.xlane.xlu1 %951  ;;  %v1041_v7 = vadd.f32 %v1040_v25, %v940_v15 }
 0x12a   : > { %1167 = vadd.xlane.f32.xlu0 %v1098_v17  ;;  %v1042_v47 = vadd.f32 %v1041_v7, %v942_v16  ;;  %v1104_v16 = vmul.f32 %v2602_v4, %v2602_v4 }
 0x12d   : > { %1181 = vadd.xlane.f32.xlu1 %v1105_v31  ;;  %1183 = vadd.xlane.f32.xlu2 %v1106_v23  ;;  %v944_v58 = vpop.xlane.xlu0 %943  ;;  %v1120_v31 = vmul.f32 %v2715_v57, %v2715_v57  ;;  %v1124_v57 = vmul.f32 %v2709_v49, %v2709_v49 }
 0x12e   : > { %v1043_v2 = vadd.f32 %v1042_v47, %v944_v58  ;;  %v1116_v58 = vmul.f32 %v2670_v59, %v2670_v59 }
 0x130   : > { %v960_v6 = vpop.xlane.xlu2 %959  ;;  %v958_v12 = vpop.xlane.xlu1 %957  ;;  %v1044_v40 = vadd.f32 %v1043_v2, %v946_v35 }
 0x132   : > { %1173 = vadd.xlane.f32.xlu0 %v1101_v13  ;;  %v1045_v55 = vadd.f32 %v1044_v40, %v948_v46  ;;  %v1123_v13 = vmul.f32 %v2727_v52, %v2727_v52  ;;  %v1127_v52 = vmul.f32 %v2721_v9, %v2721_v9 }
 0x135   : > { %1187 = vadd.xlane.f32.xlu1 %v1108_v20  ;;  %1189 = vadd.xlane.f32.xlu2 %v1109_v18  ;;  %v950_v51 = vpop.xlane.xlu0 %949  ;;  %v1119_v18 = vmul.f32 %v2682_v38, %v2682_v38 }
 0x136   : > { %v1046_v1 = vadd.f32 %v1045_v55, %v950_v51  ;;  %v1126_v55 = vmul.f32 %v2739_v29, %v2739_v29  ;;  %v1130_v29 = vmul.f32 %v2733_v61, %v2733_v61 }
 0x138   : > { %v966_v15 = vpop.xlane.xlu2 %965  ;;  %v964_v34 = vpop.xlane.xlu1 %963  ;;  %v1047_v3 = vadd.f32 %v1046_v1, %v952_v8 }
 0x13a   : > { %1179 = vadd.xlane.f32.xlu0 %v1104_v16  ;;  %v1048_v21 = vadd.f32 %v1047_v3, %v954_v30  ;;  %v1113_v30 = vmul.f32 %v2658_v44, %v2658_v44 }
 0x13d   : > { %1193 = vadd.xlane.f32.xlu1 %v1111_v24  ;;  %1195 = vadd.xlane.f32.xlu2 %v1112_v26  ;;  %v956_v11 = vpop.xlane.xlu0 %955  ;;  %v1129_v24 = vmul.f32 %v2751_v45, %v2751_v45 }
 0x13e   : > { %v1049_v14 = vadd.f32 %v1048_v21, %v956_v11  ;;  %v1125_v11 = vmul.f32 %v2706_v48, %v2706_v48 }
 0x140   : > { %v972_v63 = vpop.xlane.xlu2 %971  ;;  %v970_v4 = vpop.xlane.xlu1 %969  ;;  %v1050_v46 = vadd.f32 %v1049_v14, %v958_v12 }
 0x142   : > { %1185 = vadd.xlane.f32.xlu0 %v1107_v53  ;;  %v1051_v19 = vadd.f32 %v1050_v46, %v960_v6  ;;  %v1132_v53 = vmul.f32 %v2763_v27, %v2763_v27  ;;  %v3347_v46 = vld [vmem:[#allocation21_spill] sm:$0xff] }
 0x145   : > { %1199 = vadd.xlane.f32.xlu1 %v1114_v0  ;;  %1201 = vadd.xlane.f32.xlu2 %v1115_v39  ;;  %v962_v35 = vpop.xlane.xlu0 %961 }
 0x146   : > { %v1052_v32 = vadd.f32 %v1051_v19, %v962_v35  ;;  %v1128_v19 = vmul.f32 %v3347_v46, %v3347_v46  ;;  %v1086_v46 = vld [vmem:[#allocation5] sm:$0x1] }
 0x148   : > { %v978_v60 = vpop.xlane.xlu2 %977  ;;  %v976_v54 = vpop.xlane.xlu1 %975  ;;  %v1053_v22 = vadd.f32 %v1052_v32, %v964_v34  ;;  %v3348_v32 = vld [vmem:[#allocation29_spill] sm:$0xff] }
 0x14a   : > { %1191 = vadd.xlane.f32.xlu0 %v1110_v10  ;;  %v1054_v28 = vadd.f32 %v1053_v22, %v966_v15  ;;  %v1122_v15 = vmul.f32 %v2694_v41, %v2694_v41  ;;  %v1135_v10 = vmul.f32 %v3348_v32, %v3348_v32 }
 0x14d   : > { %1205 = vadd.xlane.f32.xlu1 %v1117_v33  ;;  %1207 = vadd.xlane.f32.xlu2 %v1118_v62  ;;  %v968_v25 = vpop.xlane.xlu0 %967 }
 0x14e   : > { %v1055_v17 = vadd.f32 %v1054_v28, %v968_v25  ;;  %v3350_v28 = vld [vmem:[#allocation22_spill] sm:$0xff] }
 0x14f   : > { %v1131_v25 = vmul.f32 %v3350_v28, %v3350_v28  ;;  %v1150_v28 = vmul.f32 %v2836_v50, %v2836_v50 }
 0x150   : > { %v984_v8 = vpop.xlane.xlu2 %983  ;;  %v982_v5 = vpop.xlane.xlu1 %981  ;;  %v1056_v23 = vadd.f32 %v1055_v17, %v970_v4 }
 0x152   : > { %1197 = vadd.xlane.f32.xlu0 %v1113_v30  ;;  %v1057_v36 = vadd.f32 %v1056_v23, %v972_v63  ;;  %v3346_v63 = vld [vmem:[#allocation24_spill] sm:$0xff] }
 0x153   : > { %v1133_v45 = vmul.f32 %v3346_v63, %v3346_v63  ;;  %v3360_v63 = vld [vmem:[#allocation41_spill] sm:$0xff] }
 0x155   : > { %1211 = vadd.xlane.f32.xlu1 %v1120_v31  ;;  %1213 = vadd.xlane.f32.xlu2 %v1121_v42  ;;  %v974_v7 = vpop.xlane.xlu0 %973  ;;  %v3352_v31 = vld [vmem:[#allocation28_spill] sm:$0xff] }
 0x156   : > { %v1058_v47 = vadd.f32 %v1057_v36, %v974_v7  ;;  %v1139_v42 = vmul.f32 %v3352_v31, %v3352_v31 }
 0x158   : > { %v990_v2 = vpop.xlane.xlu2 %989  ;;  %v988_v44 = vpop.xlane.xlu1 %987  ;;  %v1059_v6 = vadd.f32 %v1058_v47, %v976_v54 }
 0x15a   : > { %1203 = vadd.xlane.f32.xlu0 %v1116_v58  ;;  %v1060_v43 = vadd.f32 %v1059_v6, %v978_v60  ;;  %v3349_v60 = vld [vmem:[#allocation26_spill] sm:$0xff]  ;;  %v3353_v58 = vld [vmem:[#allocation23_spill] sm:$0xff] }
 0x15b   : > { %v1136_v27 = vmul.f32 %v3349_v60, %v3349_v60 }
 0x15d   : > { %1217 = vadd.xlane.f32.xlu1 %v1123_v13  ;;  %1219 = vadd.xlane.f32.xlu2 %v1124_v57  ;;  %v980_v12 = vpop.xlane.xlu0 %979  ;;  %v3354_v57 = vld [vmem:[#allocation35_spill] sm:$0xff] }
 0x15e   : > { %v1061_v20 = vadd.f32 %v1060_v43, %v980_v12  ;;  %v1141_v6 = vmul.f32 %v3354_v57, %v3354_v57  ;;  %v3355_v43 = vld [vmem:[#allocation31_spill] sm:$0xff] }
 0x15f   : > { %v1142_v12 = vmul.f32 %v3355_v43, %v3355_v43 }
 0x160   : > { %v996_v40 = vpop.xlane.xlu2 %995  ;;  %v994_v59 = vpop.xlane.xlu1 %993  ;;  %v1062_v51 = vadd.f32 %v1061_v20, %v982_v5 }
 0x162   : > { %1209 = vadd.xlane.f32.xlu0 %v1119_v18  ;;  %v1063_v49 = vadd.f32 %v1062_v51, %v984_v8  ;;  %v3351_v8 = vld [vmem:[#allocation32_spill] sm:$0xff] }
 0x163   : > { %v1138_v5 = vmul.f32 %v3351_v8, %v3351_v8 }
 0x165   : > { %1223 = vadd.xlane.f32.xlu1 %v1126_v55  ;;  %1225 = vadd.xlane.f32.xlu2 %v1127_v52  ;;  %v986_v1 = vpop.xlane.xlu0 %985  ;;  %v3356_v55 = vld [vmem:[#allocation25_spill] sm:$0xff] }
 0x166   : > { %v1064_v16 = vadd.f32 %v1063_v49, %v986_v1  ;;  %v1137_v52 = vmul.f32 %v3356_v55, %v3356_v55  ;;  %v3357_v1 = vld [vmem:[#allocation38_spill] sm:$0xff] }
 0x168   : > { %v1002_v34 = vpop.xlane.xlu2 %1001  ;;  %v1000_v38 = vpop.xlane.xlu1 %999  ;;  %v1065_v26 = vadd.f32 %v1064_v16, %v988_v44  ;;  %v1144_v16 = vmul.f32 %v3357_v1, %v3357_v1 }
 0x16a   : > { %1215 = vadd.xlane.f32.xlu0 %v1122_v15  ;;  %v1066_v9 = vadd.f32 %v1065_v26, %v990_v2  ;;  %v1134_v2 = vmul.f32 %v3353_v58, %v3353_v58  ;;  %v3358_v15 = vld [vmem:[#allocation34_spill] sm:$0xff]  ;;  %v3365_v58 = vld [vmem:[#allocation43_spill] sm:$0xff] }
 0x16b   : > { %v1154_v50 = vmul.f32 %v3365_v58, %v3365_v58 }
 0x16d   : > { %1229 = vadd.xlane.f32.xlu1 %v1129_v24  ;;  %1231 = vadd.xlane.f32.xlu2 %v1130_v29  ;;  %v992_v3 = vpop.xlane.xlu0 %991 }
 0x16e   : > { %v1067_v21 = vadd.f32 %v1066_v9, %v992_v3 }
 0x170   : > { %v1008_v14 = vpop.xlane.xlu2 %1007  ;;  %v1006_v41 = vpop.xlane.xlu1 %1005  ;;  %v1068_v4 = vadd.f32 %v1067_v21, %v994_v59 }
 0x172   : > { %1221 = vadd.xlane.f32.xlu0 %v1125_v11  ;;  %v1069_v61 = vadd.f32 %v1068_v4, %v996_v40  ;;  %v3359_v11 = vld [vmem:[#allocation27_spill] sm:$0xff]  ;;  %v3361_v4 = vld [vmem:[#allocation37_spill] sm:$0xff] }
 0x175   : > { %1235 = vadd.xlane.f32.xlu1 %v1132_v53  ;;  %1237 = vadd.xlane.f32.xlu2 %v1133_v45  ;;  %v998_v0 = vpop.xlane.xlu0 %997  ;;  %v1147_v45 = vmul.f32 %v3360_v63, %v3360_v63 }
 0x176   : > { %v1070_v39 = vadd.f32 %v1069_v61, %v998_v0  ;;  %v1148_v61 = vmul.f32 %v3361_v4, %v3361_v4 }
 0x178   : > { %v1014_v35 = vpop.xlane.xlu2 %1013  ;;  %v1012_v48 = vpop.xlane.xlu1 %1011  ;;  %v1071_v54 = vadd.f32 %v1070_v39, %v1000_v38 }
 0x17a   : > { %1227 = vadd.xlane.f32.xlu0 %v1128_v19  ;;  %v1072_v33 = vadd.f32 %v1071_v54, %v1002_v34  ;;  %v1145_v34 = vmul.f32 %v3358_v15, %v3358_v15  ;;  %v1089_v19 = vld [vmem:[#allocation7] sm:$0x1]  ;;  %v3362_v54 = vld [vmem:[#allocation30_spill] sm:$0xff] }
 0x17d   : > { %1241 = vadd.xlane.f32.xlu1 %v1135_v10  ;;  %1243 = vadd.xlane.f32.xlu2 %v1136_v27  ;;  %v1004_v62 = vpop.xlane.xlu0 %1003 }
 0x17e   : > { %v1073_v22 = vadd.f32 %v1072_v33, %v1004_v62  ;;  %v1143_v33 = vmul.f32 %v3362_v54, %v3362_v54 }
 0x180   : > { %v1160_v17 = vpop.xlane.xlu2 %1159  ;;  %v1158_v30 = vpop.xlane.xlu1 %1157  ;;  %v1074_v23 = vadd.f32 %v1073_v22, %v1006_v41 }
 0x181   : > { %v1285_v26 = vadd.f32 %v1160_v17, %v1158_v30 }
 0x182   : > { %1233 = vadd.xlane.f32.xlu0 %v1131_v25  ;;  %v1075_v36 = vadd.f32 %v1074_v23, %v1008_v14  ;;  %v1140_v14 = vmul.f32 %v3359_v11, %v3359_v11  ;;  %v3363_v25 = vld [vmem:[#allocation40_spill] sm:$0xff] }
 0x183   : > { %v1151_v17 = vmul.f32 %v3363_v25, %v3363_v25 }
 0x185   : > { %1247 = vadd.xlane.f32.xlu1 %v1138_v5  ;;  %1249 = vadd.xlane.f32.xlu2 %v1139_v42  ;;  %v1010_v7 = vpop.xlane.xlu0 %1009  ;;  %v3364_v42 = vld [vmem:[#allocation33_spill] sm:$0xff] }
 0x186   : > { %v1076_v47 = vadd.f32 %v1075_v36, %v1010_v7  ;;  %v1146_v23 = vmul.f32 %v3364_v42, %v3364_v42 }
 0x188   : > { %v1164_v44 = vpop.xlane.xlu1 %1163  ;;  %v1166_v13 = vpop.xlane.xlu2 %1165  ;;  %v1077_v20 = vadd.f32 %v1076_v47, %v1012_v48  ;;  %v1153_v47 = vmul.f32 %v2844_v56, %v2844_v56 }
 0x18a   : > { %1239 = vadd.xlane.f32.xlu0 %v1134_v2  ;;  %v1078_v18 = vadd.f32 %v1077_v20, %v1014_v35 }
 0x18d   : > { %1253 = vadd.xlane.f32.xlu1 %v1141_v6  ;;  %1255 = vadd.xlane.f32.xlu2 %v1142_v12  ;;  %v1016_v40 = vpop.xlane.xlu0 %1015  ;;  %v3366_v6 = vld [vmem:[#allocation36_spill] sm:$0xff] }
 0x18e   : > { %v1079_v59 = vadd.f32 %v1078_v18, %v1016_v40  ;;  %v1149_v43 = vmul.f32 %v3366_v6, %v3366_v6  ;;  %v1156_v18 = vmul.f32 %v2853_v37, %v2853_v37 }
 0x190   : > { %v1170_v51 = vpop.xlane.xlu1 %1169  ;;  %v1172_v49 = vpop.xlane.xlu2 %1171  ;;  %v1080_v38 = vrot.slane %v1079_v59, 4 }
 0x192   : > { %v1081_v24 = vadd.f32 %v1080_v38, %v1079_v59  ;;  %1245 = vadd.xlane.f32.xlu0 %v1137_v52  ;;  %v3367_v52 = vld [vmem:[#allocation39_spill] sm:$0xff] }
 0x194   : > { %v1082_v29 = vrot.slane %v1081_v24, 2 }
 0x195   : > { %1259 = vadd.xlane.f32.xlu1 %v1144_v16  ;;  %1261 = vadd.xlane.f32.xlu2 %v1145_v34  ;;  %v1162_v9 = vpop.xlane.xlu0 %1161 }
 0x196   : > { %v1083_v3 = vadd.f32 %v1082_v29, %v1081_v24  ;;  %v1286_v21 = vadd.f32 %v1285_v26, %v1162_v9  ;;  %v3368_v24 = vld [vmem:[#allocation42_spill] sm:$0xff] }
 0x197   : > { %v1155_v29 = vmul.f32 %v3368_v24, %v3368_v24 }
 0x198   : > { %v1176_v41 = vpop.xlane.xlu1 %1175  ;;  %v1178_v53 = vpop.xlane.xlu2 %1177  ;;  %v1084_v0 = vrot.slane %v1083_v3, 1  ;;  %v1287_v39 = vadd.f32 %v1286_v21, %v1164_v44 }
 0x19a   : > { %v1085_v35 = vadd.f32 %v1084_v0, %v1083_v3  ;;  %1251 = vadd.xlane.f32.xlu0 %v1140_v14  ;;  %v1288_v10 = vadd.f32 %v1287_v39, %v1166_v13 }
 0x19c   : > { %v1087_v48 = vadd.f32 %v1086_v46, %v1085_v35  ;;  %v1090_v32 = vadd.f32 %v1089_v19, %v1085_v35 }
 0x19d   : > { %1265 = vadd.xlane.f32.xlu1 %v1147_v45  ;;  %1267 = vadd.xlane.f32.xlu2 %v1148_v61  ;;  %v1168_v60 = vpop.xlane.xlu0 %1167 }
 0x19e   : > { %1088 = vst.msk [vmem:[#allocation5] sm:$0x1] %vm675_vm3, %v1087_v48  ;;  %v1289_v27 = vadd.f32 %v1288_v10, %v1168_v60 }
 0x19f   : > { %1091 = vst.msk [vmem:[#allocation7] sm:$0x1] %vm675_vm3, %v1090_v32 }
 0x1a0   : > { %v1182_v62 = vpop.xlane.xlu1 %1181  ;;  %v1184_v22 = vpop.xlane.xlu2 %1183  ;;  %v1290_v30 = vadd.f32 %v1289_v27, %v1170_v51  ;;  %v1152_v51 = vmul.f32 %v3367_v52, %v3367_v52 }
 0x1a2   : > { %1257 = vadd.xlane.f32.xlu0 %v1143_v33  ;;  %v1291_v8 = vadd.f32 %v1290_v30, %v1172_v49 }
 0x1a5   : > { %1271 = vadd.xlane.f32.xlu1 %v1150_v28  ;;  %1273 = vadd.xlane.f32.xlu2 %v1151_v17  ;;  %v1174_v5 = vpop.xlane.xlu0 %1173 }
 0x1a6   : > { %v1292_v31 = vadd.f32 %v1291_v8, %v1174_v5 }
 0x1a8   : > { %v1188_v36 = vpop.xlane.xlu1 %1187  ;;  %v1190_v7 = vpop.xlane.xlu2 %1189  ;;  %v1293_v2 = vadd.f32 %v1292_v31, %v1176_v41 }
 0x1aa   : > { %1263 = vadd.xlane.f32.xlu0 %v1146_v23  ;;  %v1294_v44 = vadd.f32 %v1293_v2, %v1178_v53 }
 0x1ad   : > { %1277 = vadd.xlane.f32.xlu1 %v1153_v47  ;;  %1279 = vadd.xlane.f32.xlu2 %v1154_v50  ;;  %v1180_v13 = vpop.xlane.xlu0 %1179 }
 0x1ae   : > { %v1295_v57 = vadd.f32 %v1294_v44, %v1180_v13 }
 0x1b0   : > { %v1194_v12 = vpop.xlane.xlu1 %1193  ;;  %v1196_v20 = vpop.xlane.xlu2 %1195  ;;  %v1296_v40 = vadd.f32 %v1295_v57, %v1182_v62 }
 0x1b2   : > { %1269 = vadd.xlane.f32.xlu0 %v1149_v43  ;;  %v1297_v56 = vadd.f32 %v1296_v40, %v1184_v22 }
 0x1b5   : > { %1283 = vadd.xlane.f32.xlu1 %v1156_v18  ;;  %v1186_v59 = vpop.xlane.xlu0 %1185 }
 0x1b6   : > { %v1298_v55 = vadd.f32 %v1297_v56, %v1186_v59 }
 0x1b8   : > { %v1200_v49 = vpop.xlane.xlu1 %1199  ;;  %v1202_v1 = vpop.xlane.xlu2 %1201  ;;  %v1299_v16 = vadd.f32 %v1298_v55, %v1188_v36 }
 0x1ba   : > { %1275 = vadd.xlane.f32.xlu0 %v1152_v51  ;;  %v1300_v15 = vadd.f32 %v1299_v16, %v1190_v7 }
 0x1bd   : > { %v1192_v34 = vpop.xlane.xlu0 %1191 }
 0x1be   : > { %v1301_v38 = vadd.f32 %v1300_v15, %v1192_v34 }
 0x1c0   : > { %v1206_v37 = vpop.xlane.xlu1 %1205  ;;  %v1208_v26 = vpop.xlane.xlu2 %1207  ;;  %v1302_v9 = vadd.f32 %v1301_v38, %v1194_v12 }
 0x1c2   : > { %1281 = vadd.xlane.f32.xlu0 %v1155_v29  ;;  %v1303_v3 = vadd.f32 %v1302_v9, %v1196_v20 }
 0x1c5   : > { %v1198_v21 = vpop.xlane.xlu0 %1197 }
 0x1c6   : > { %v1304_v11 = vadd.f32 %v1303_v3, %v1198_v21 }
 0x1c8   : > { %v1212_v14 = vpop.xlane.xlu1 %1211  ;;  %v1214_v41 = vpop.xlane.xlu2 %1213  ;;  %v1305_v53 = vadd.f32 %v1304_v11, %v1200_v49 }
 0x1ca   : > { %v1306_v63 = vadd.f32 %v1305_v53, %v1202_v1 }
 0x1cd   : > { %v1204_v45 = vpop.xlane.xlu0 %1203 }
 0x1ce   : > { %v1307_v4 = vadd.f32 %v1306_v63, %v1204_v45 }
 0x1d0   : > { %v1218_v61 = vpop.xlane.xlu1 %1217  ;;  %v1220_v0 = vpop.xlane.xlu2 %1219  ;;  %v1308_v39 = vadd.f32 %v1307_v4, %v1206_v37 }
 0x1d2   : > { %v1309_v46 = vadd.f32 %v1308_v39, %v1208_v26 }
 0x1d5   : > { %v1210_v19 = vpop.xlane.xlu0 %1209 }
 0x1d6   : > { %v1310_v35 = vadd.f32 %v1309_v46, %v1210_v19 }
 0x1d8   : > { %v1224_v48 = vpop.xlane.xlu1 %1223  ;;  %v1226_v32 = vpop.xlane.xlu2 %1225  ;;  %v1311_v10 = vadd.f32 %v1310_v35, %v1212_v14 }
 0x1da   : > { %v1312_v60 = vadd.f32 %v1311_v10, %v1214_v41 }
 0x1dd   : > { %v1216_v27 = vpop.xlane.xlu0 %1215 }
 0x1de   : > { %v1313_v54 = vadd.f32 %v1312_v60, %v1216_v27 }
 0x1e0   : > { %v1230_v33 = vpop.xlane.xlu1 %1229  ;;  %v1314_v62 = vadd.f32 %v1313_v54, %v1218_v61  ;;  %v1232_v22 = vpop.xlane.xlu2 %1231 }
 0x1e2   : > { %v1315_v28 = vadd.f32 %v1314_v62, %v1220_v0 }
 0x1e5   : > { %v1222_v25 = vpop.xlane.xlu0 %1221 }
 0x1e6   : > { %v1316_v17 = vadd.f32 %v1315_v28, %v1222_v25 }
 0x1e8   : > { %v1236_v30 = vpop.xlane.xlu1 %1235  ;;  %v1317_v8 = vadd.f32 %v1316_v17, %v1224_v48  ;;  %v1238_v5 = vpop.xlane.xlu2 %1237  ;;  %v1092_v17 = vld [vmem:[#allocation6] sm:$0x1] }
 0x1ea   : > { %v1318_v31 = vadd.f32 %v1317_v8, %v1226_v32 }
 0x1ed   : > { %v1228_v42 = vpop.xlane.xlu0 %1227 }
 0x1ee   : > { %v1319_v23 = vadd.f32 %v1318_v31, %v1228_v42 }
 0x1f0   : > { %v1242_v36 = vpop.xlane.xlu1 %1241  ;;  %v1320_v7 = vadd.f32 %v1319_v23, %v1230_v33  ;;  %v1244_v50 = vpop.xlane.xlu2 %1243 }
 0x1f2   : > { %v1321_v47 = vadd.f32 %v1320_v7, %v1232_v22 }
 0x1f5   : > { %v1234_v58 = vpop.xlane.xlu0 %1233 }
 0x1f6   : > { %v1322_v2 = vadd.f32 %v1321_v47, %v1234_v58 }
 0x1f8   : > { %v1323_v44 = vadd.f32 %v1322_v2, %v1236_v30  ;;  %v1248_v13 = vpop.xlane.xlu1 %1247  ;;  %v1250_v12 = vpop.xlane.xlu2 %1249 }
 0x1fa   : > { %v1324_v57 = vadd.f32 %v1323_v44, %v1238_v5 }
 0x1fd   : > { %v1240_v6 = vpop.xlane.xlu0 %1239 }
 0x1fe   : > { %v1325_v43 = vadd.f32 %v1324_v57, %v1240_v6 }
 0x200   : > { %v1326_v20 = vadd.f32 %v1325_v43, %v1242_v36  ;;  %v1254_v18 = vpop.xlane.xlu1 %1253  ;;  %v1256_v52 = vpop.xlane.xlu2 %1255 }
 0x202   : > { %v1327_v40 = vadd.f32 %v1326_v20, %v1244_v50 }
 0x205   : > { %v1246_v56 = vpop.xlane.xlu0 %1245 }
 0x206   : > { %v1328_v59 = vadd.f32 %v1327_v40, %v1246_v56 }
 0x208   : > { %v1329_v55 = vadd.f32 %v1328_v59, %v1248_v13  ;;  %v1260_v1 = vpop.xlane.xlu1 %1259  ;;  %v1262_v34 = vpop.xlane.xlu2 %1261 }
 0x20a   : > { %v1330_v51 = vadd.f32 %v1329_v55, %v1250_v12 }
 0x20d   : > { %v1252_v49 = vpop.xlane.xlu0 %1251 }
 0x20e   : > { %v1331_v16 = vadd.f32 %v1330_v51, %v1252_v49 }
 0x210   : > { %v1332_v15 = vadd.f32 %v1331_v16, %v1254_v18  ;;  %v1266_v37 = vpop.xlane.xlu1 %1265  ;;  %v1268_v21 = vpop.xlane.xlu2 %1267 }
 0x212   : > { %v1333_v38 = vadd.f32 %v1332_v15, %v1256_v52 }
 0x215   : > { %v1258_v24 = vpop.xlane.xlu0 %1257 }
 0x216   : > { %v1334_v29 = vadd.f32 %v1333_v38, %v1258_v24 }
 0x218   : > { %v1335_v26 = vadd.f32 %v1334_v29, %v1260_v1  ;;  %v1272_v41 = vpop.xlane.xlu1 %1271  ;;  %v1274_v4 = vpop.xlane.xlu2 %1273 }
 0x21a   : > { %v1336_v9 = vadd.f32 %v1335_v26, %v1262_v34 }
 0x21d   : > { %v1264_v3 = vpop.xlane.xlu0 %1263 }
 0x21e   : > { %v1337_v11 = vadd.f32 %v1336_v9, %v1264_v3 }
 0x220   : > { %v1338_v14 = vadd.f32 %v1337_v11, %v1266_v37  ;;  %v1278_v0 = vpop.xlane.xlu1 %1277  ;;  %v1280_v48 = vpop.xlane.xlu2 %1279 }
 0x222   : > { %v1339_v53 = vadd.f32 %v1338_v14, %v1268_v21 }
 0x225   : > { %v1270_v63 = vpop.xlane.xlu0 %1269 }
 0x226   : > { %v1340_v45 = vadd.f32 %v1339_v53, %v1270_v63 }
 0x228   : > { %v1341_v61 = vadd.f32 %v1340_v45, %v1272_v41  ;;  %v1284_v60 = vpop.xlane.xlu1 %1283 }
 0x22a   : > { %v1342_v39 = vadd.f32 %v1341_v61, %v1274_v4 }
 0x22d   : > { %v1276_v46 = vpop.xlane.xlu0 %1275 }
 0x22e   : > { %v1343_v19 = vadd.f32 %v1342_v39, %v1276_v46 }
 0x230   : > { %v1344_v35 = vadd.f32 %v1343_v19, %v1278_v0 }
 0x232   : > { %v1345_v32 = vadd.f32 %v1344_v35, %v1280_v48 }
 0x235   : > { %v1282_v10 = vpop.xlane.xlu0 %1281 }
 0x236   : > { %v1346_v27 = vadd.f32 %v1345_v32, %v1282_v10 }
 0x238   : > { %v1347_v54 = vadd.f32 %v1346_v27, %v1284_v60 }
 0x23a   : > { %v1348_v33 = vrot.slane %v1347_v54, 4 }
 0x23c   : > { %v1349_v62 = vadd.f32 %v1348_v33, %v1347_v54 }
 0x23e   : > { %v1350_v22 = vrot.slane %v1349_v62, 2 }
 0x240   : > { %v1351_v28 = vadd.f32 %v1350_v22, %v1349_v62 }
 0x242   : > { %v1352_v25 = vrot.slane %v1351_v28, 1 }
 0x244   : > { %v1353_v30 = vadd.f32 %v1352_v25, %v1351_v28  ;;  %1358 = sbr.rel (%p2006_p8) target bundleno = 891 (0x37b), region = 72 }
 0x246   : > { %v1354_v8 = vadd.f32 %v1353_v30, %v1092_v17 }
 0x248   : > { %1355 = vst.msk [vmem:[#allocation6] sm:$0x1] %vm675_vm3, %v1354_v8 }
 0x249   : > { %v2983_v5 = vld [vmem:[%s3369_s16 + $0x10] sm:$0xff]  ;;  %v2988_v31 = vld [vmem:[%s3370_s24] sm:$0xff]  ;;  %v3001_v47 = vld [vmem:[%s3370_s24 + $0x18] sm:$0xff] }
 0x24a   : > { %v2993_v42 = vld [vmem:[%s3370_s24 + $0x20] sm:$0xff]  ;;  %v1394_v23 = vand.u32 2147483647, %v2983_v5  ;;  %v1392_v36 = vand.u32 2147483647, %v2988_v31  ;;  %v3006_v58 = vld [vmem:[%s3370_s24 + $0x8] sm:$0xff]  ;;  %v1533_v54 = vmul.f32 %v2988_v31, %v2988_v31  ;;  %v1535_v33 = vmul.f32 %v2983_v5, %v2983_v5 }
 0x24b   : > { %v1396_v7 = vand.u32 2147483647, %v2993_v42  ;;  %v3011_v50 = vld [vmem:[%s3370_s24 + $0x28] sm:$0xff]  ;;  %v1395_v2 = vand.u32 2147483647, %v3001_v47  ;;  %v3019_v57 = vld [vmem:[%s3370_s24 + $0x38] sm:$0xff]  ;;  %v1534_v27 = vmul.f32 %v3006_v58, %v3006_v58  ;;  %v1537_v62 = vmul.f32 %v2993_v42, %v2993_v42 }
 0x24c   : > { %1430 = vadd.xlane.f32.xlu1 %v1394_v23  ;;  %1426 = vadd.xlane.f32.xlu0 %v1392_v36  ;;  %v1393_v44 = vand.u32 2147483647, %v3006_v58  ;;  %v1397_v13 = vand.u32 2147483647, %v3011_v50  ;;  %v3024_v6 = vld [vmem:[%s3370_s24 + $0x30] sm:$0xff]  ;;  %v3029_v43 = vld [vmem:[%s3370_s24 + $0x40] sm:$0xff]  ;;  %v1536_v22 = vmul.f32 %v3001_v47, %v3001_v47  ;;  %v1538_v28 = vmul.f32 %v3011_v50, %v3011_v50 }
 0x24d   : > { %1434 = vadd.xlane.f32.xlu2 %v1396_v7  ;;  %v1399_v12 = vand.u32 2147483647, %v3019_v57  ;;  %v1398_v20 = vand.u32 2147483647, %v3024_v6  ;;  %v1400_v18 = vand.u32 2147483647, %v3029_v43  ;;  %v1540_v25 = vmul.f32 %v3019_v57, %v3019_v57 }
 0x24e   : > { %v3037_v40 = vld [vmem:[%s3370_s24 + $0x50] sm:$0xff]  ;;  %v3042_v56 = vld [vmem:[%s3370_s24 + $0x48] sm:$0xff]  ;;  %v3047_v59 = vld [vmem:[%s3370_s24 + $0x58] sm:$0xff]  ;;  %v1539_v17 = vmul.f32 %v3024_v6, %v3024_v6  ;;  %v1541_v30 = vmul.f32 %v3029_v43, %v3029_v43 }
 0x24f   : > { %v1402_v55 = vand.u32 2147483647, %v3037_v40  ;;  %v1401_v52 = vand.u32 2147483647, %v3042_v56  ;;  %v1403_v51 = vand.u32 2147483647, %v3047_v59  ;;  %v1543_v8 = vmul.f32 %v3037_v40, %v3037_v40 }
 0x250   : > { %v3055_v49 = vld [vmem:[%s3370_s24 + $0x68] sm:$0xff]  ;;  %v3060_v1 = vld [vmem:[%s3370_s24 + $0x60] sm:$0xff]  ;;  %v3065_v16 = vld [vmem:[%s3370_s24 + $0x70] sm:$0xff]  ;;  %v1542_v5 = vmul.f32 %v3042_v56, %v3042_v56  ;;  %v1544_v31 = vmul.f32 %v3047_v59, %v3047_v59 }
 0x251   : > { %v1405_v15 = vand.u32 2147483647, %v3055_v49  ;;  %v1404_v34 = vand.u32 2147483647, %v3060_v1  ;;  %v1406_v38 = vand.u32 2147483647, %v3065_v16  ;;  %v1546_v42 = vmul.f32 %v3055_v49, %v3055_v49 }
 0x252   : > { %v3073_v24 = vld [vmem:[%s3370_s24 + $0x80] sm:$0xff]  ;;  %v3078_v29 = vld [vmem:[%s3370_s24 + $0x78] sm:$0xff]  ;;  %v3083_v37 = vld [vmem:[%s3370_s24 + $0x88] sm:$0xff]  ;;  %v1545_v23 = vmul.f32 %v3060_v1, %v3060_v1  ;;  %v1547_v36 = vmul.f32 %v3065_v16, %v3065_v16 }
 0x253   : > { %v1408_v26 = vand.u32 2147483647, %v3073_v24  ;;  %v1407_v9 = vand.u32 2147483647, %v3078_v29  ;;  %v1409_v3 = vand.u32 2147483647, %v3083_v37  ;;  %v1549_v7 = vmul.f32 %v3073_v24, %v3073_v24 }
 0x254   : > { %1432 = vadd.xlane.f32.xlu1 %v1395_v2  ;;  %1428 = vadd.xlane.f32.xlu0 %v1393_v44  ;;  %v3091_v21 = vld [vmem:[%s3370_s24 + $0x98] sm:$0xff]  ;;  %v3096_v11 = vld [vmem:[%s3370_s24 + $0x90] sm:$0xff]  ;;  %v3101_v14 = vld [vmem:[%s3370_s24 + $0xa0] sm:$0xff]  ;;  %v1548_v47 = vmul.f32 %v3078_v29, %v3078_v29  ;;  %v1550_v58 = vmul.f32 %v3083_v37, %v3083_v37 }
 0x255   : > { %1436 = vadd.xlane.f32.xlu2 %v1397_v13  ;;  %v1411_v41 = vand.u32 2147483647, %v3091_v21  ;;  %v1410_v53 = vand.u32 2147483647, %v3096_v11  ;;  %v1412_v63 = vand.u32 2147483647, %v3101_v14  ;;  %v1552_v13 = vmul.f32 %v3091_v21, %v3091_v21 }
 0x256   : > { %v3109_v45 = vld [vmem:[%s3370_s24 + $0xb0] sm:$0xff]  ;;  %v3114_v4 = vld [vmem:[%s3370_s24 + $0xa8] sm:$0xff]  ;;  %v3119_v61 = vld [vmem:[%s3370_s24 + $0xb8] sm:$0xff]  ;;  %v1551_v57 = vmul.f32 %v3096_v11, %v3096_v11  ;;  %v1553_v6 = vmul.f32 %v3101_v14, %v3101_v14 }
 0x257   : > { %v1414_v0 = vand.u32 2147483647, %v3109_v45  ;;  %v1413_v39 = vand.u32 2147483647, %v3114_v4  ;;  %v1415_v46 = vand.u32 2147483647, %v3119_v61  ;;  %v1555_v40 = vmul.f32 %v3109_v45, %v3109_v45 }
 0x258   : > { %v3127_v19 = vld [vmem:[%s3370_s24 + $0xc8] sm:$0xff]  ;;  %v3132_v35 = vld [vmem:[%s3370_s24 + $0xc0] sm:$0xff]  ;;  %v3137_v48 = vld [vmem:[%s3370_s24 + $0xd0] sm:$0xff]  ;;  %v1554_v56 = vmul.f32 %v3114_v4, %v3114_v4  ;;  %v1556_v59 = vmul.f32 %v3119_v61, %v3119_v61 }
 0x259   : > { %v1417_v32 = vand.u32 2147483647, %v3127_v19  ;;  %v1416_v10 = vand.u32 2147483647, %v3132_v35  ;;  %v1418_v60 = vand.u32 2147483647, %v3137_v48  ;;  %v1559_v24 = vmul.f32 %v3137_v48, %v3137_v48 }
 0x25c   : > { %1440 = vadd.xlane.f32.xlu1 %v1399_v12  ;;  %1438 = vadd.xlane.f32.xlu0 %v1398_v20 }
 0x25d   : > { %1442 = vadd.xlane.f32.xlu2 %v1400_v18 }
 0x264   : > { %1446 = vadd.xlane.f32.xlu1 %v1402_v55  ;;  %1444 = vadd.xlane.f32.xlu0 %v1401_v52 }
 0x265   : > { %1448 = vadd.xlane.f32.xlu2 %v1403_v51 }
 0x26c   : > { %1452 = vadd.xlane.f32.xlu1 %v1405_v15  ;;  %1450 = vadd.xlane.f32.xlu0 %v1404_v34  ;;  %v1558_v34 = vmul.f32 %v3127_v19, %v3127_v19 }
 0x26d   : > { %1454 = vadd.xlane.f32.xlu2 %v1406_v38  ;;  %v1557_v38 = vmul.f32 %v3132_v35, %v3132_v35 }
 0x274   : > { %1458 = vadd.xlane.f32.xlu1 %v1408_v26  ;;  %1456 = vadd.xlane.f32.xlu0 %v1407_v9  ;;  %v1386_v26 = vld [vmem:[%s3370_s24 + $0xd8] sm:$0xff] }
 0x275   : > { %1460 = vadd.xlane.f32.xlu2 %v1409_v3  ;;  %v1387_v3 = vld [vmem:[%s3370_s24 + $0xe0] sm:$0xff] }
 0x276   : > { %v1420_v45 = vand.u32 2147483647, %v1387_v3 }
 0x27c   : > { %1464 = vadd.xlane.f32.xlu1 %v1411_v41  ;;  %1462 = vadd.xlane.f32.xlu0 %v1410_v53  ;;  %v1560_v53 = vmul.f32 %v1386_v26, %v1386_v26 }
 0x27d   : > { %1466 = vadd.xlane.f32.xlu2 %v1412_v63  ;;  %v1419_v63 = vand.u32 2147483647, %v1386_v26 }
 0x284   : > { %1470 = vadd.xlane.f32.xlu1 %v1414_v0  ;;  %1468 = vadd.xlane.f32.xlu0 %v1413_v39  ;;  %v1388_v0 = vld [vmem:[%s3370_s24 + $0xe8] sm:$0xff] }
 0x285   : > { %1472 = vadd.xlane.f32.xlu2 %v1415_v46  ;;  %v1421_v48 = vand.u32 2147483647, %v1388_v0 }
 0x28c   : > { %1476 = vadd.xlane.f32.xlu1 %v1417_v32  ;;  %1474 = vadd.xlane.f32.xlu0 %v1416_v10  ;;  %v1561_v32 = vmul.f32 %v1387_v3, %v1387_v3  ;;  %v1562_v10 = vmul.f32 %v1388_v0, %v1388_v0 }
 0x28d   : > { %1478 = vadd.xlane.f32.xlu2 %v1418_v60 }
 0x294   : > { %1568 = vadd.xlane.f32.xlu1 %v1534_v27  ;;  %1566 = vadd.xlane.f32.xlu0 %v1533_v54  ;;  %v1389_v54 = vld [vmem:[%s3370_s24 + $0xf0] sm:$0xff] }
 0x295   : > { %1570 = vadd.xlane.f32.xlu2 %v1535_v33  ;;  %v1390_v33 = vld [vmem:[%s3370_s24 + $0xf8] sm:$0xff] }
 0x29c   : > { %1574 = vadd.xlane.f32.xlu1 %v1537_v62  ;;  %1572 = vadd.xlane.f32.xlu0 %v1536_v22 }
 0x29d   : > { %1576 = vadd.xlane.f32.xlu2 %v1538_v28 }
 0x2a4   : > { %1580 = vadd.xlane.f32.xlu1 %v1540_v25  ;;  %1578 = vadd.xlane.f32.xlu0 %v1539_v17  ;;  %v1563_v17 = vmul.f32 %v1389_v54, %v1389_v54 }
 0x2a5   : > { %1582 = vadd.xlane.f32.xlu2 %v1541_v30  ;;  %v1422_v30 = vand.u32 2147483647, %v1389_v54 }
 0x2ac   : > { %1586 = vadd.xlane.f32.xlu1 %v1543_v8  ;;  %1584 = vadd.xlane.f32.xlu0 %v1542_v5  ;;  %v1423_v8 = vand.u32 2147483647, %v1390_v33 }
 0x2ad   : > { %1588 = vadd.xlane.f32.xlu2 %v1544_v31 }
 0x2b4   : > { %1592 = vadd.xlane.f32.xlu1 %v1546_v42  ;;  %1590 = vadd.xlane.f32.xlu0 %v1545_v23  ;;  %v1391_v42 = vld [vmem:[%s3370_s24 + $0x100] sm:$0xff] }
 0x2b5   : > { %1594 = vadd.xlane.f32.xlu2 %v1547_v36 }
 0x2bc   : > { %1598 = vadd.xlane.f32.xlu1 %v1549_v7  ;;  %1596 = vadd.xlane.f32.xlu0 %v1548_v47 }
 0x2bd   : > { %1600 = vadd.xlane.f32.xlu2 %v1550_v58  ;;  %v1424_v58 = vand.u32 2147483647, %v1391_v42 }
 0x2bf   : > { %v1431_v50 = vpop.xlane.xlu1 %1430  ;;  %v1427_v2 = vpop.xlane.xlu0 %1426 }
 0x2c0   : > { %v1435_v44 = vpop.xlane.xlu2 %1434 }
 0x2c4   : > { %1604 = vadd.xlane.f32.xlu1 %v1552_v13  ;;  %1602 = vadd.xlane.f32.xlu0 %v1551_v57 }
 0x2c5   : > { %1606 = vadd.xlane.f32.xlu2 %v1553_v6 }
 0x2c7   : > { %v1433_v43 = vpop.xlane.xlu1 %1432  ;;  %v1429_v12 = vpop.xlane.xlu0 %1428 }
 0x2c8   : > { %v1492_v20 = vadd.f32 %v1429_v12, %v1427_v2  ;;  %v1437_v18 = vpop.xlane.xlu2 %1436  ;;  %v1565_v2 = vmul.f32 %v1391_v42, %v1391_v42 }
 0x2ca   : > { %v1493_v55 = vadd.f32 %v1492_v20, %v1431_v50  ;;  %v1564_v50 = vmul.f32 %v1390_v33, %v1390_v33 }
 0x2cc   : > { %v1494_v52 = vadd.f32 %v1493_v55, %v1433_v43  ;;  %1610 = vadd.xlane.f32.xlu1 %v1555_v40  ;;  %1608 = vadd.xlane.f32.xlu0 %v1554_v56 }
 0x2cd   : > { %1612 = vadd.xlane.f32.xlu2 %v1556_v59 }
 0x2ce   : > { %v1495_v51 = vadd.f32 %v1494_v52, %v1435_v44 }
 0x2cf   : > { %v1441_v49 = vpop.xlane.xlu1 %1440  ;;  %v1439_v1 = vpop.xlane.xlu0 %1438 }
 0x2d0   : > { %v1496_v16 = vadd.f32 %v1495_v51, %v1437_v18  ;;  %v1443_v15 = vpop.xlane.xlu2 %1442 }
 0x2d2   : > { %v1497_v29 = vadd.f32 %v1496_v16, %v1439_v1 }
 0x2d4   : > { %v1498_v37 = vadd.f32 %v1497_v29, %v1441_v49  ;;  %1616 = vadd.xlane.f32.xlu1 %v1558_v34  ;;  %1614 = vadd.xlane.f32.xlu0 %v1557_v38 }
 0x2d5   : > { %1618 = vadd.xlane.f32.xlu2 %v1559_v24 }
 0x2d6   : > { %v1499_v9 = vadd.f32 %v1498_v37, %v1443_v15 }
 0x2d7   : > { %v1447_v21 = vpop.xlane.xlu1 %1446  ;;  %v1445_v11 = vpop.xlane.xlu0 %1444 }
 0x2d8   : > { %v1500_v14 = vadd.f32 %v1499_v9, %v1445_v11  ;;  %v1449_v41 = vpop.xlane.xlu2 %1448 }
 0x2da   : > { %v1501_v4 = vadd.f32 %v1500_v14, %v1447_v21 }
 0x2dc   : > { %v1502_v61 = vadd.f32 %v1501_v4, %v1449_v41  ;;  %1620 = vadd.xlane.f32.xlu1 %v1560_v53  ;;  %1480 = vadd.xlane.f32.xlu0 %v1419_v63 }
 0x2dd   : > { %1482 = vadd.xlane.f32.xlu2 %v1420_v45 }
 0x2df   : > { %v1453_v39 = vpop.xlane.xlu1 %1452  ;;  %v1451_v46 = vpop.xlane.xlu0 %1450 }
 0x2e0   : > { %v1503_v19 = vadd.f32 %v1502_v61, %v1451_v46  ;;  %v1455_v35 = vpop.xlane.xlu2 %1454 }
 0x2e2   : > { %v1504_v60 = vadd.f32 %v1503_v19, %v1453_v39 }
 0x2e4   : > { %v1505_v27 = vadd.f32 %v1504_v60, %v1455_v35  ;;  %1484 = vadd.xlane.f32.xlu1 %v1421_v48  ;;  %1622 = vadd.xlane.f32.xlu0 %v1561_v32 }
 0x2e5   : > { %1624 = vadd.xlane.f32.xlu2 %v1562_v10 }
 0x2e7   : > { %v1459_v62 = vpop.xlane.xlu1 %1458  ;;  %v1457_v22 = vpop.xlane.xlu0 %1456 }
 0x2e8   : > { %v1506_v28 = vadd.f32 %v1505_v27, %v1457_v22  ;;  %v1461_v25 = vpop.xlane.xlu2 %1460 }
 0x2ea   : > { %v1507_v5 = vadd.f32 %v1506_v28, %v1459_v62 }
 0x2ec   : > { %v1508_v31 = vadd.f32 %v1507_v5, %v1461_v25  ;;  %1626 = vadd.xlane.f32.xlu1 %v1563_v17  ;;  %1486 = vadd.xlane.f32.xlu0 %v1422_v30 }
 0x2ed   : > { %1488 = vadd.xlane.f32.xlu2 %v1423_v8 }
 0x2ef   : > { %v1465_v23 = vpop.xlane.xlu1 %1464  ;;  %v1463_v36 = vpop.xlane.xlu0 %1462 }
 0x2f0   : > { %v1509_v7 = vadd.f32 %v1508_v31, %v1463_v36  ;;  %v1467_v47 = vpop.xlane.xlu2 %1466 }
 0x2f2   : > { %v1510_v44 = vadd.f32 %v1509_v7, %v1465_v23 }
 0x2f4   : > { %v1511_v13 = vadd.f32 %v1510_v44, %v1467_v47  ;;  %1490 = vadd.xlane.f32.xlu1 %v1424_v58  ;;  %1628 = vadd.xlane.f32.xlu0 %v1564_v50 }
 0x2f5   : > { %1630 = vadd.xlane.f32.xlu2 %v1565_v2 }
 0x2f7   : > { %v1471_v57 = vpop.xlane.xlu1 %1470  ;;  %v1469_v6 = vpop.xlane.xlu0 %1468 }
 0x2f8   : > { %v1512_v43 = vadd.f32 %v1511_v13, %v1469_v6  ;;  %v1473_v12 = vpop.xlane.xlu2 %1472 }
 0x2fa   : > { %v1513_v20 = vadd.f32 %v1512_v43, %v1471_v57 }
 0x2fc   : > { %v1514_v18 = vadd.f32 %v1513_v20, %v1473_v12 }
 0x2ff   : > { %v1477_v40 = vpop.xlane.xlu1 %1476  ;;  %v1475_v56 = vpop.xlane.xlu0 %1474 }
 0x300   : > { %v1515_v59 = vadd.f32 %v1514_v18, %v1475_v56  ;;  %v1479_v55 = vpop.xlane.xlu2 %1478 }
 0x302   : > { %v1516_v52 = vadd.f32 %v1515_v59, %v1477_v40 }
 0x304   : > { %v1517_v51 = vadd.f32 %v1516_v52, %v1479_v55 }
 0x307   : > { %v1569_v49 = vpop.xlane.xlu1 %1568  ;;  %v1567_v1 = vpop.xlane.xlu0 %1566 }
 0x308   : > { %v1571_v16 = vpop.xlane.xlu2 %1570  ;;  %v1632_v15 = vadd.f32 %v1569_v49, %v1567_v1 }
 0x30a   : > { %v1633_v34 = vadd.f32 %v1632_v15, %v1571_v16 }
 0x30f   : > { %v1575_v38 = vpop.xlane.xlu1 %1574  ;;  %v1573_v24 = vpop.xlane.xlu0 %1572 }
 0x310   : > { %v1634_v29 = vadd.f32 %v1633_v34, %v1573_v24  ;;  %v1577_v37 = vpop.xlane.xlu2 %1576 }
 0x312   : > { %v1635_v26 = vadd.f32 %v1634_v29, %v1575_v38 }
 0x314   : > { %v1636_v9 = vadd.f32 %v1635_v26, %v1577_v37 }
 0x317   : > { %v1581_v3 = vpop.xlane.xlu1 %1580  ;;  %v1579_v21 = vpop.xlane.xlu0 %1578 }
 0x318   : > { %v1637_v11 = vadd.f32 %v1636_v9, %v1579_v21  ;;  %v1583_v14 = vpop.xlane.xlu2 %1582 }
 0x31a   : > { %v1638_v41 = vadd.f32 %v1637_v11, %v1581_v3 }
 0x31c   : > { %v1639_v45 = vadd.f32 %v1638_v41, %v1583_v14 }
 0x31f   : > { %v1587_v53 = vpop.xlane.xlu1 %1586  ;;  %v1585_v63 = vpop.xlane.xlu0 %1584 }
 0x320   : > { %v1589_v4 = vpop.xlane.xlu2 %1588  ;;  %v1640_v61 = vadd.f32 %v1639_v45, %v1585_v63 }
 0x322   : > { %v1641_v0 = vadd.f32 %v1640_v61, %v1587_v53 }
 0x324   : > { %v1642_v35 = vadd.f32 %v1641_v0, %v1589_v4 }
 0x327   : > { %v1593_v39 = vpop.xlane.xlu1 %1592  ;;  %v1591_v46 = vpop.xlane.xlu0 %1590 }
 0x328   : > { %v1595_v19 = vpop.xlane.xlu2 %1594  ;;  %v1643_v48 = vadd.f32 %v1642_v35, %v1591_v46  ;;  %v1532_v35 = vld [vmem:[#allocation6] sm:$0x1] }
 0x32a   : > { %v1644_v60 = vadd.f32 %v1643_v48, %v1593_v39  ;;  %v1425_v39 = vld [vmem:[#allocation5] sm:$0x1] }
 0x32c   : > { %v1645_v54 = vadd.f32 %v1644_v60, %v1595_v19 }
 0x32f   : > { %v1599_v32 = vpop.xlane.xlu1 %1598  ;;  %v1597_v10 = vpop.xlane.xlu0 %1596 }
 0x330   : > { %v1601_v27 = vpop.xlane.xlu2 %1600  ;;  %v1646_v33 = vadd.f32 %v1645_v54, %v1597_v10 }
 0x332   : > { %v1647_v25 = vadd.f32 %v1646_v33, %v1599_v32 }
 0x334   : > { %v1648_v17 = vadd.f32 %v1647_v25, %v1601_v27 }
 0x337   : > { %v1605_v62 = vpop.xlane.xlu1 %1604  ;;  %v1603_v22 = vpop.xlane.xlu0 %1602 }
 0x338   : > { %v1607_v28 = vpop.xlane.xlu2 %1606  ;;  %v1649_v5 = vadd.f32 %v1648_v17, %v1603_v22 }
 0x33a   : > { %v1650_v42 = vadd.f32 %v1649_v5, %v1605_v62 }
 0x33c   : > { %v1651_v7 = vadd.f32 %v1650_v42, %v1607_v28 }
 0x33f   : > { %v1611_v30 = vpop.xlane.xlu1 %1610  ;;  %v1609_v8 = vpop.xlane.xlu0 %1608 }
 0x340   : > { %v1613_v31 = vpop.xlane.xlu2 %1612  ;;  %v1652_v58 = vadd.f32 %v1651_v7, %v1609_v8 }
 0x342   : > { %v1653_v50 = vadd.f32 %v1652_v58, %v1611_v30 }
 0x344   : > { %v1654_v57 = vadd.f32 %v1653_v50, %v1613_v31 }
 0x347   : > { %v1617_v23 = vpop.xlane.xlu1 %1616  ;;  %v1615_v36 = vpop.xlane.xlu0 %1614 }
 0x348   : > { %v1619_v47 = vpop.xlane.xlu2 %1618  ;;  %v1655_v6 = vadd.f32 %v1654_v57, %v1615_v36 }
 0x34a   : > { %v1656_v20 = vadd.f32 %v1655_v6, %v1617_v23 }
 0x34c   : > { %v1657_v56 = vadd.f32 %v1656_v20, %v1619_v47 }
 0x34f   : > { %v1621_v2 = vpop.xlane.xlu1 %1620  ;;  %v1481_v44 = vpop.xlane.xlu0 %1480 }
 0x350   : > { %v1483_v13 = vpop.xlane.xlu2 %1482  ;;  %v1518_v40 = vadd.f32 %v1517_v51, %v1481_v44  ;;  %v1658_v59 = vadd.f32 %v1657_v56, %v1621_v2 }
 0x352   : > { %v1519_v55 = vadd.f32 %v1518_v40, %v1483_v13 }
 0x357   : > { %v1485_v43 = vpop.xlane.xlu1 %1484  ;;  %v1623_v12 = vpop.xlane.xlu0 %1622 }
 0x358   : > { %v1625_v18 = vpop.xlane.xlu2 %1624  ;;  %v1520_v1 = vadd.f32 %v1519_v55, %v1485_v43  ;;  %v1659_v16 = vadd.f32 %v1658_v59, %v1623_v12 }
 0x35a   : > { %v1660_v38 = vadd.f32 %v1659_v16, %v1625_v18 }
 0x35f   : > { %v1627_v52 = vpop.xlane.xlu1 %1626  ;;  %v1487_v49 = vpop.xlane.xlu0 %1486 }
 0x360   : > { %v1489_v15 = vpop.xlane.xlu2 %1488  ;;  %v1521_v34 = vadd.f32 %v1520_v1, %v1487_v49  ;;  %v1661_v24 = vadd.f32 %v1660_v38, %v1627_v52 }
 0x362   : > { %v1522_v29 = vadd.f32 %v1521_v34, %v1489_v15 }
 0x367   : > { %v1491_v37 = vpop.xlane.xlu1 %1490  ;;  %v1629_v26 = vpop.xlane.xlu0 %1628 }
 0x368   : > { %v1523_v9 = vadd.f32 %v1522_v29, %v1491_v37  ;;  %v1662_v3 = vadd.f32 %v1661_v24, %v1629_v26  ;;  %v1631_v21 = vpop.xlane.xlu2 %1630 }
 0x36a   : > { %v1524_v11 = vrot.slane %v1523_v9, 4  ;;  %v1663_v14 = vadd.f32 %v1662_v3, %v1631_v21 }
 0x36c   : > { %v1525_v51 = vadd.f32 %v1524_v11, %v1523_v9  ;;  %v1664_v41 = vrot.slane %v1663_v14, 4 }
 0x36e   : > { %v1526_v53 = vrot.slane %v1525_v51, 2  ;;  %v1665_v63 = vadd.f32 %v1664_v41, %v1663_v14 }
 0x370   : > { %v1527_v45 = vadd.f32 %v1526_v53, %v1525_v51  ;;  %v1666_v4 = vrot.slane %v1665_v63, 2 }
 0x372   : > { %v1528_v61 = vrot.slane %v1527_v45, 1  ;;  %v1667_v0 = vadd.f32 %v1666_v4, %v1665_v63 }
 0x374   : > { %v1529_v46 = vadd.f32 %v1528_v61, %v1527_v45  ;;  %v1668_v19 = vrot.slane %v1667_v0, 1 }
 0x376   : > { %v1530_v48 = vadd.f32 %v1529_v46, %v1425_v39  ;;  %v1669_v32 = vadd.f32 %v1668_v19, %v1667_v0 }
 0x378   : > { %1531 = vst.msk [vmem:[#allocation5] sm:$0x1] %vm675_vm3, %v1530_v48  ;;  %v1670_v10 = vadd.f32 %v1669_v32, %v1532_v35 }
 0x37a   : > { %1671 = vst.msk [vmem:[#allocation6] sm:$0x1] %vm675_vm3, %v1670_v10 }
 0x37b PF: > { %p1672_p9 = scmp.eq.s32.totalorder %s2284_s13, 1  ;;  %p2007_p10 = scmp.ne.s32.totalorder %s2284_s13, 1 }
 0x37d   : > { %1675 = sbr.rel (%p2007_p10) target bundleno = 1189 (0x4a5), region = 76 }
 0x382   : > { %v1677_v60 = vld [vmem:[#allocation2] sm:$0xff]  ;;  %v2303_v27 = vmov 0   ;;  %v1717_v52 = vld [vmem:[#allocation8] sm:$0x1]  ;;  %vm1722_vm10 = vcmask 0  }
 0x383   : > { %2139 = vset.pattern.permute.xlu0 %v2303_v27  ;;  %2140 = vrsqrt.f32 %v1677_v60  ;;  %vm1685_vm4 = vcmp.eq.f32.partialorder %v1677_v60, inf  ;;  %v1688_v17 = vand.u32 2147483648, %v1677_v60  ;;  %vm1687_vm5 = vcmp.eq.f32.partialorder %v1677_v60, 0.0  ;;  %v1676_v57 = vld [vmem:[%s2485_s23] sm:$0xff] }
 0x389   : > { %v2141_v54 = vpop.eup %2140 }
 0x38a   : > { %v1679_v33 = vmul.f32 %v2141_v54, %v1677_v60 }
 0x38c   : > { %v1680_v62 = vmul.f32 %v2141_v54, %v1679_v33 }
 0x38e   : > { %v1681_v22 = vmul.f32 0.5, %v1680_v62 }
 0x390   : > { %v1682_v28 = vsub.f32 1.5, %v1681_v22 }
 0x392   : > { %v1683_v25 = vmul.f32 %v2141_v54, %v1682_v28 }
 0x394   : > { %v1684_v30 = vmul.f32 %v1683_v25, %v1677_v60 }
 0x396   : > { %v1686_v8 = vsel %vm1685_vm4, %v1677_v60, %v1684_v30 }
 0x397   : > { %v1689_v5 = vsel %vm1687_vm5, %v1688_v17, %v1686_v8 }
 0x398   : > { %v1690_v31 = vmax.f32 %v1689_v5, 1e-12 }
 0x39a   : > { %2142 = vrcp.f32 %v1690_v31  ;;  %v1702_v36 = vand.u32 2147483648, %v1690_v31  ;;  %vm1696_vm6 = vweird.f32 %v1690_v31  ;;  %v1700_v47 = vand.u32 2147483647, %v1690_v31 }
 0x39c   : > { %v1703_v50 = vor.u32 1.1754944e-38, %v1702_v36  ;;  %vm1701_vm9 = vcmp.eq.f32.partialorder %v1700_v47, 8.507059e+37 }
 0x3a0   : > { %v2143_v42 = vpop.eup %2142 }
 0x3a1   : > { %v1692_v23 = vmul.f32 %v2143_v42, %v1690_v31  ;;  %vm1697_vm7 = vweird.f32 %v2143_v42 }
 0x3a2   : > { %vm1698_vm8 = vmor %vm1696_vm6, %vm1697_vm7 }
 0x3a3   : > { %v1693_v7 = vsub.f32 1.0, %v1692_v23 }
 0x3a5   : > { %v1694_v58 = vmul.f32 %v2143_v42, %v1693_v7 }
 0x3a7   : > { %v1695_v2 = vadd.f32 %v2143_v42, %v1694_v58 }
 0x3a9   : > { %v1699_v44 = vsel %vm1698_vm8, %v2143_v42, %v1695_v2 }
 0x3aa   : > { %v1704_v13 = vsel %vm1701_vm9, %v1703_v50, %v1699_v44 }
 0x3ab   : > { %1707 = vperm.xlu0 %2139, %v1704_v13  }
 0x41d   : > { %v1708_v6 = vpop.permute.xlu0 %1707 }
 0x41e   : > { %v1710_v43 = vmul.f32 %v1708_v6, %v1676_v57 }
 0x420   : > { %v1711_v12 = vrot.slane %v1710_v43, 4 }
 0x422   : > { %v1712_v20 = vadd.f32 %v1711_v12, %v1710_v43 }
 0x424   : > { %v1713_v18 = vrot.slane %v1712_v20, 2 }
 0x426   : > { %v1714_v40 = vadd.f32 %v1713_v18, %v1712_v20 }
 0x428   : > { %v1715_v56 = vrot.slane %v1714_v40, 1 }
 0x42a   : > { %v1716_v59 = vadd.f32 %v1715_v56, %v1714_v40 }
 0x42c   : > { %v1718_v55 = vmul.f32 %v1716_v59, %v1716_v59 }
 0x42e   : > { %1719 = vadd.xlane.f32.xlu0 %v1718_v55 }
 0x4a1   : > { %v1720_v49 = vpop.xlane.xlu0 %1719 }
 0x4a2   : > { %v1721_v1 = vadd.f32 %v1720_v49, %v1717_v52 }
 0x4a4   : > { %1723 = vst.msk [vmem:[#allocation8] sm:$0x1] %vm1722_vm10, %v1721_v1 }
 0x4a5 PF: > { %p1724_p11 = scmp.eq.s32.totalorder %s2280_s12, 3 }
 0x4a7   : > { %p1725_p12 = pnand %p1724_p11, %p1672_p9 }
 0x4a8   : > { %s1731_s23 = smul.f32 (!%p1725_p12), 512.0, %s2476_s18  ;;  %s3371_s18 = sld [smem:[#allocation51_spill]] (!%p1725_p12) }
 0x4a9   : > { %1728 = sbr.rel (%p1725_p12) target bundleno = 1375 (0x55f), region = 80 }
 0x4ae   : > { %v1729_v16 = vld [vmem:[#allocation3] sm:$0x1]  ;;  %v2304_v15 = vmov 0   ;;  %v1770_v38 = vld [vmem:[#allocation8] sm:$0x1]  ;;  %v1732_v24 = vstv %s1731_s23  ;;  %v1737_v26 = vld [vmem:[#allocation2] sm:$0xff]  ;;  %v1776_v7 = vlaneseq }
 0x4af   : > { %2144 = vset.pattern.permute.xlu0 %v2304_v15  ;;  %v1730_v34 = vmul.f32 -0.125, %v1729_v16  ;;  %2145 = vset.pattern.permute.xlu1 %v2304_v15  ;;  %v1734_v29 = vld [vmem:[#allocation4] sm:$0x1]  ;;  %v1771_v37 = vmul.f32 0.125, %v1770_v38  ;;  %2147 = vrsqrt.f32 %v1737_v26  ;;  %v1775_v45 = vld [vmem:[#allocation7] sm:$0x1] }
 0x4b0   : > { %2146 = vset.pattern.permute.xlu2 %v2304_v15  ;;  %v1735_v21 = vmul.f32 -0.125, %v1734_v29  ;;  %vm1745_vm11 = vcmp.eq.f32.partialorder %v1737_v26, inf  ;;  %v1748_v61 = vand.u32 2147483648, %v1737_v26  ;;  %vm1747_vm12 = vcmp.eq.f32.partialorder %v1737_v26, 0.0  ;;  %v1773_v48 = vld [vmem:[#allocation5] sm:$0x1] }
 0x4b1   : > { %v1733_v9 = vadd.f32 %v1732_v24, %v1730_v34  ;;  %v1772_v3 = vsub.f32 8.0, %v1771_v37  ;;  %vm1750_vm13 = vcmask 7168   ;;  %1812 = vperm.xlu2 %2146, %v1773_v48   ;;  %v1774_v27 = vld [vmem:[#allocation6] sm:$0x1]  ;;  %v1777_v58 = vand.u32 127, %v1776_v7 }
 0x4b2   : > { %v1736_v14 = vadd.f32 %v1735_v21, %v1732_v24 }
 0x4b3   : > { %1781 = vperm.xlu0 %2144, %v1733_v9   ;;  %1804 = vperm.xlu1 %2145, %v1772_v3   ;;  %vm1778_vm14 = vcmp.eq.s32.totalorder %v1777_v58, 0  ;;  %vm1786_vm15 = vcmp.eq.s32.totalorder %v1777_v58, 1  ;;  %vm1794_vm0 = vcmp.eq.s32.totalorder %v1777_v58, 2  ;;  %vm1801_vm1 = vcmp.eq.s32.totalorder %v1777_v58, 3 }
 0x4b4   : > { %vm1809_vm2 = vcmp.eq.s32.totalorder %v1777_v58, 4  ;;  %vm1817_vm3 = vcmp.eq.s32.totalorder %v1777_v58, 5  ;;  %vm1825_vm4 = vcmp.eq.s32.totalorder %v1777_v58, 6 }
 0x4b5   : > { %v2148_v11 = vpop.eup %2147 }
 0x4b6   : > { %v1739_v51 = vmul.f32 %v2148_v11, %v1737_v26 }
 0x4b8   : > { %v1740_v41 = vmul.f32 %v2148_v11, %v1739_v51 }
 0x4b9   : > { %1820 = vperm.xlu2 %2146, %v1774_v27  }
 0x4ba   : > { %v1741_v53 = vmul.f32 0.5, %v1740_v41 }
 0x4bb   : > { %1789 = vperm.xlu0 %2144, %v1736_v14  }
 0x4bc   : > { %v1742_v63 = vsub.f32 1.5, %v1741_v53 }
 0x4be   : > { %v1743_v4 = vmul.f32 %v2148_v11, %v1742_v63 }
 0x4c0   : > { %v1744_v0 = vmul.f32 %v1743_v4, %v1737_v26 }
 0x4c2   : > { %v1746_v39 = vsel %vm1745_vm11, %v1737_v26, %v1744_v0 }
 0x4c3   : > { %1828 = vperm.xlu0 %2144, %v1775_v45   ;;  %v1749_v46 = vsel %vm1747_vm12, %v1748_v61, %v1746_v39 }
 0x4c4   : > { %v1752_v19 = vsel %vm1750_vm13, %v1749_v46, 0.0  ;;  %1751 = vst.msk [vmem:[#allocation14] sm:$0xff] %vm1750_vm13, %v1749_v46 }
 0x4c5   : > { %v1753_v35 = vrot.slane %v1752_v19, 4 }
 0x4c7   : > { %v1754_v32 = vadd.f32 %v1753_v35, %v1752_v19 }
 0x4c9   : > { %v1755_v10 = vrot.slane %v1754_v32, 2 }
 0x4cb   : > { %v1756_v60 = vadd.f32 %v1755_v10, %v1754_v32 }
 0x4cd   : > { %v1757_v54 = vrot.slane %v1756_v60, 1 }
 0x4cf   : > { %v1758_v33 = vadd.f32 %v1757_v54, %v1756_v60 }
 0x4d1   : > { %v1759_v62 = vmul.f32 0.125, %v1758_v33 }
 0x4d3   : > { %v1760_v22 = vsub.f32 %v1749_v46, %v1759_v62 }
 0x4d5   : > { %v1761_v28 = vmul.f32 %v1760_v22, %v1760_v22 }
 0x4d7   : > { %v1762_v25 = vsel %vm1750_vm13, %v1761_v28, 0.0 }
 0x4d8   : > { %v1763_v17 = vrot.slane %v1762_v25, 4 }
 0x4da   : > { %v1764_v30 = vadd.f32 %v1763_v17, %v1762_v25 }
 0x4dc   : > { %v1765_v8 = vrot.slane %v1764_v30, 2 }
 0x4de   : > { %v1766_v5 = vadd.f32 %v1765_v8, %v1764_v30 }
 0x4e0   : > { %v1767_v31 = vrot.slane %v1766_v5, 1 }
 0x4e2   : > { %v1768_v42 = vadd.f32 %v1767_v31, %v1766_v5 }
 0x4e4   : > { %v1769_v23 = vmul.f32 2.0, %v1768_v42 }
 0x4e6   : > { %1797 = vperm.xlu1 %2145, %v1769_v23  }
 0x50b   : > { %v1813_v47 = vpop.permute.xlu2 %1812 }
 0x50c   : > { %v1815_v40 = vperm.slane %v1813_v47, 0 }
 0x513   : > { %v1821_v6 = vpop.permute.xlu2 %1820 }
 0x514   : > { %v1823_v59 = vperm.slane %v1821_v6, 0 }
 0x525   : > { %v1782_v36 = vpop.permute.xlu0 %1781  ;;  %v1805_v2 = vpop.permute.xlu1 %1804 }
 0x526   : > { %v1784_v44 = vperm.slane %v1782_v36, 0  ;;  %v1807_v12 = vperm.slane %v1805_v2, 0 }
 0x528   : > { %v1785_v57 = vsel %vm1778_vm14, %v1784_v44, 0.0 }
 0x52d   : > { %v1790_v50 = vpop.permute.xlu0 %1789 }
 0x52e   : > { %v1792_v13 = vperm.slane %v1790_v50, 0 }
 0x530   : > { %v1793_v18 = vsel %vm1786_vm15, %v1792_v13, %v1785_v57 }
 0x535   : > { %v1829_v43 = vpop.permute.xlu0 %1828 }
 0x536   : > { %v1831_v52 = vperm.slane %v1829_v43, 0 }
 0x558   : > { %v1798_v20 = vpop.permute.xlu1 %1797 }
 0x559   : > { %v1800_v56 = vsel %vm1794_vm0, %v1798_v20, %v1793_v18 }
 0x55a   : > { %v1808_v55 = vsel %vm1801_vm1, %v1807_v12, %v1800_v56 }
 0x55b   : > { %v1816_v49 = vsel %vm1809_vm2, %v1815_v40, %v1808_v55 }
 0x55c   : > { %v1824_v1 = vsel %vm1817_vm3, %v1823_v59, %v1816_v49 }
 0x55d   : > { %v1832_v16 = vsel %vm1825_vm4, %v1831_v52, %v1824_v1 }
 0x55e   : > { %1833 = vst [vmem:[%s3371_s18] sm:$0x1] %v1832_v16 }
 0x55f PF: > { %s3372_s21 = sld [smem:[#allocation20_spill]]  ;;  %s2305_s4 = smov [#allocation14]  }
 0x560   : > { %s3374_s22 = sld [smem:[#allocation52_spill]]  ;;  %s1843_s6 = sshll.u32 %s2305_s4, 4  ;;  %s1844_s6 = int_to_ptr.vmem [resolvable:$true] %s1843_s6 }
 0x565   : > { %s3373_s20 = sadd.s32 4294967295, %s3372_s21  }
 0x566   : > { %p2033_p13 = scmp.eq.s32.totalorder %s3373_s20, 7  ;;  %s1845_s26 = sshll.u32 %s3374_s22, 4  ;;  %s1846_s26 = int_to_ptr.hbm [resolvable:$true] %s1845_s26 }
 0x568   : > { %2019 = dma.vmem_to_hbm [thread:$0]  (%p2033_p13), %s1844_s6, 128, %s1846_s26, [#allocation11]  }
 0x569   : > { %2263 = dma.done.wait (%p2033_p13), [#allocation11], 128  }
 0x56a   : > { %2265 = vsyncadd (%p2033_p13), [#allocation11], 4294967168 }
 0x56b PF: > { %s3375_s17 = sld [smem:[#allocation20_spill]]  ;;  %s3378_s30 = smov %s2272_s10 }
 0x56c   : > { %s3376_s12 = sld [smem:[#allocation18_spill]]  ;;  %s3379_s10 = smov %s2276_s11 }
 0x56d   : > { %s3377_s13 = sld [smem:[#allocation19_spill]]  ;;  %s3380_s11 = smov %s2450_s3 }
 0x56e   : > { %s3381_s14 = smov %s3384_s27  ;;  %s3382_s15 = smov %s3388_s28 }
 0x571   : > { %s25_s16 = sadd.s32 1, %s3375_s17  }
 0x572   : > { %p22_p0 = scmp.ge.s32.totalorder %s25_s16, 10  }
 0x574   :  { %24 = sbr.rel (!%p22_p0) target bundleno = 17 (0x11), region = 137 }
 0x579   :  { %1862 = vsyncpa [#allocation10], 1 }
 0x57a   :  { %1864 = vsyncpa [#allocation10 + $0x1], 1 }
 0x57b   :  { %1865 = vsyncpa [#allocation11], 1 }
 0x57c   :  { %1867 = vsyncpa [#allocation11 + $0x1], 1 }
 0x57d   :  { %1868 = vsyncpa [#allocation12], 1 }
 0x57e   :  { %1870 = vsyncpa [#allocation12 + $0x1], 1 }

</bundles_post_ra>
